<compile_context>
chip_gen: v5e
topology: v5e:2x2
jax: 0.10.0
libtpu: 0.0.40
codegen_flags: <defaults>
</compile_context>

<pallas_src>
import functools

import jax
import jax.numpy as jnp
from jax.experimental import pallas as pl
from jax.experimental.pallas import tpu as pltpu


def _gelu_tanh(x):
    c = jnp.float32(0.7978845608028654)  # sqrt(2/pi)
    return 0.5 * x * (1.0 + jnp.tanh(c * (x + 0.044715 * (x * x * x))))


def _layernorm_torch(x, gamma, beta, eps, dim):
    # Matches the reference LayerNorm: unbiased std (divide by dim-1), /(std + eps).
    mean = jnp.mean(x, axis=-1, keepdims=True)
    d = x - mean
    var = jnp.sum(d * d, axis=-1, keepdims=True) * (1.0 / (dim - 1))
    inv = pl.reciprocal(jnp.sqrt(var) + eps, approx=True)   # EUP, VALU stays free
    return gamma * (d * inv) + beta


def _const_spec(shape):
    """Grid-invariant parameter spec: constant index map + single pipeline buffer."""
    idx = lambda *_: (0,) * len(shape)
    try:
        return pl.BlockSpec(shape, idx, pipeline_mode=pl.Buffered(1))
    except (TypeError, AttributeError):
        # Older BlockSpec signature without pipeline_mode: fall back to default buffering.
        return pl.BlockSpec(shape, idx)


# --------------------------------------------------------------------------------------
# Fused single-pass kernel: one (bt, N, C) block per grid step, everything stays in VMEM.
# --------------------------------------------------------------------------------------
def _fused_kernel(x_ref, g1_ref, b1_ref, g2_ref, b2_ref,
                  w1_ref, c1_ref, w2_ref, c2_ref, o_ref,
                  *, dim, hidden, eps, h_chunk):
    bt, n, _ = x_ref.shape
    x = x_ref[...].astype(jnp.float32)                       # (bt, n, C)

    # norm1 + global mean over N + residual
    y1 = _layernorm_torch(x, g1_ref[...], b1_ref[...], eps, dim)
    pooled = jnp.mean(y1, axis=1, keepdims=True)              # (bt, 1, C)
    x1 = x + pooled

    # norm2 + H-tiled MLP + residual
    y2 = _layernorm_torch(x1, g2_ref[...], b2_ref[...], eps, dim)
    x1_2d = x1.reshape(bt * n, dim)
    y2_bf = y2.reshape(bt * n, dim).astype(jnp.bfloat16)      # bf16 MXU operand

    m = jnp.zeros((bt * n, dim), jnp.float32)
    for h0 in range(0, hidden, h_chunk):                      # static loop over H chunks
        h1 = min(h0 + h_chunk, hidden)
        h = jnp.dot(y2_bf, w1_ref[:, h0:h1],
                    preferred_element_type=jnp.float32) + c1_ref[:, h0:h1]
        h = _gelu_tanh(h)
        m = m + jnp.dot(h.astype(jnp.bfloat16), w2_ref[h0:h1, :],
                        preferred_element_type=jnp.float32)

    out = x1_2d + m + c2_ref[...]
    o_ref[...] = out.reshape(bt, n, dim).astype(o_ref.dtype)


def _poolformer_fused(x, g1, b1, g2, b2, w1, c1, w2, c2, *, eps, bt, h_chunk, vmem_limit):
    B, N, C = x.shape
    H = w1.shape[1]
    kernel = functools.partial(_fused_kernel, dim=C, hidden=H, eps=eps, h_chunk=h_chunk)
    return pl.pallas_call(
        kernel,
        out_shape=jax.ShapeDtypeStruct((B, N, C), x.dtype),
        grid_spec=pltpu.PrefetchScalarGridSpec(
            num_scalar_prefetch=0,
            grid=(B // bt,),
            in_specs=[
                pl.BlockSpec((bt, N, C), lambda i: (i, 0, 0)),   # x
                _const_spec((1, C)), _const_spec((1, C)),        # norm1 w, b
                _const_spec((1, C)), _const_spec((1, C)),        # norm2 w, b
                _const_spec((C, H)), _const_spec((1, H)),        # fc1 weight.T, bias
                _const_spec((H, C)), _const_spec((1, C)),        # fc2 weight.T, bias
            ],
            out_specs=pl.BlockSpec((bt, N, C), lambda i: (i, 0, 0)),
        ),
        compiler_params=pltpu.CompilerParams(
            dimension_semantics=("parallel",),
            vmem_limit_bytes=vmem_limit),
    )(x, g1, b1, g2, b2, w1, c1, w2, c2)


# --------------------------------------------------------------------------------------
# N-tiled two-pass path for large sequences: pass 1 reduces the pooled vector over
# N-tiles ("arbitrary" axis + pl.when init/finalize), pass 2 does LN2 + MLP per N-tile.
# --------------------------------------------------------------------------------------
def _pool_kernel(x_ref, g1_ref, b1_ref, pooled_ref, *, dim, eps, inv_n):
    n_idx = pl.program_id(1)

    @pl.when(n_idx == 0)
    def _():
        pooled_ref[...] = jnp.zeros_like(pooled_ref)

    x = x_ref[0].astype(jnp.float32)                               # (tn, C)
    y1 = _layernorm_torch(x, g1_ref[...], b1_ref[...], eps, dim)
    pooled_ref[0] = pooled_ref[0] + jnp.sum(y1, axis=0, keepdims=True)

    @pl.when(n_idx == pl.num_programs(1) - 1)
    def _():
        pooled_ref[...] = pooled_ref[...] * inv_n


def _mlp_kernel(x_ref, pooled_ref, g2_ref, b2_ref,
                w1_ref, c1_ref, w2_ref, c2_ref, o_ref,
                *, dim, hidden, eps, h_chunk):
    x = x_ref[0].astype(jnp.float32)                               # (tn, C)
    x1 = x + pooled_ref[0].astype(jnp.float32)                     # broadcast (1, C)
    y2 = _layernorm_torch(x1, g2_ref[...], b2_ref[...], eps, dim)
    y2_bf = y2.astype(jnp.bfloat16)

    m = jnp.zeros((x.shape[0], dim), jnp.float32)
    for h0 in range(0, hidden, h_chunk):
        h1 = min(h0 + h_chunk, hidden)
        h = jnp.dot(y2_bf, w1_ref[:, h0:h1],
                    preferred_element_type=jnp.float32) + c1_ref[:, h0:h1]
        h = _gelu_tanh(h)
        m = m + jnp.dot(h.astype(jnp.bfloat16), w2_ref[h0:h1, :],
                        preferred_element_type=jnp.float32)

    o_ref[0] = (x1 + m + c2_ref[...]).astype(o_ref.dtype)


def _poolformer_tiled(x, g1, b1, g2, b2, w1, c1, w2, c2, *, eps, tn, h_chunk, vmem_limit):
    B, N, C = x.shape
    H = w1.shape[1]
    NT = N // tn

    pooled = pl.pallas_call(
        functools.partial(_pool_kernel, dim=C, eps=eps, inv_n=1.0 / N),
        out_shape=jax.ShapeDtypeStruct((B, 1, C), jnp.float32),
        grid_spec=pltpu.PrefetchScalarGridSpec(
            num_scalar_prefetch=0,
            grid=(B, NT),
            in_specs=[
                pl.BlockSpec((1, tn, C), lambda b, n: (b, n, 0)),
                _const_spec((1, C)), _const_spec((1, C)),
            ],
            out_specs=pl.BlockSpec((1, 1, C), lambda b, n: (b, 0, 0)),
        ),
        compiler_params=pltpu.CompilerParams(
            dimension_semantics=("parallel", "arbitrary"),
            vmem_limit_bytes=vmem_limit),
    )(x, g1, b1)

    return pl.pallas_call(
        functools.partial(_mlp_kernel, dim=C, hidden=H, eps=eps, h_chunk=h_chunk),
        out_shape=jax.ShapeDtypeStruct((B, N, C), x.dtype),
        grid_spec=pltpu.PrefetchScalarGridSpec(
            num_scalar_prefetch=0,
            grid=(B, NT),
            in_specs=[
                pl.BlockSpec((1, tn, C), lambda b, n: (b, n, 0)),   # x
                pl.BlockSpec((1, 1, C), lambda b, n: (b, 0, 0)),    # pooled
                _const_spec((1, C)), _const_spec((1, C)),           # norm2 w, b
                _const_spec((C, H)), _const_spec((1, H)),           # fc1
                _const_spec((H, C)), _const_spec((1, C)),           # fc2
            ],
            out_specs=pl.BlockSpec((1, tn, C), lambda b, n: (b, n, 0)),
        ),
        compiler_params=pltpu.CompilerParams(
            dimension_semantics=("parallel", "parallel"),
            vmem_limit_bytes=vmem_limit),
    )(x, pooled, g2, b2, w1, c1, w2, c2)


# --------------------------------------------------------------------------------------
# Public wrapper: chooses between fused and N-tiled paths based on a VMEM budget.
# --------------------------------------------------------------------------------------
def _pick_tn(N, C, h_chunk, budget, weights_bytes):
    cands = [d for d in range(N, 0, -1) if N % d == 0 and (d % 8 == 0 or d == N)]
    for d in cands:
        est = 9 * d * C * 4 + d * h_chunk * 4 + weights_bytes
        if est <= budget:
            return d
    return cands[-1]


def poolformer_block(x, g1, b1, g2, b2, w1, c1, w2, c2, *,
                     eps=1e-6, h_chunk=512, force_ntile=None):
    """x: (B, N, C). w1 = fc1.weight.T (C, H), w2 = fc2.weight.T (H, C)."""
    B, N, C = x.shape
    H = w1.shape[1]

    # 2-D parameter layouts: the lane axis carries the channel/hidden dim.
    g1 = g1.reshape(1, C).astype(jnp.float32)
    b1 = b1.reshape(1, C).astype(jnp.float32)
    g2 = g2.reshape(1, C).astype(jnp.float32)
    b2 = b2.reshape(1, C).astype(jnp.float32)
    c1 = c1.reshape(1, H).astype(jnp.float32)
    c2 = c2.reshape(1, C).astype(jnp.float32)
    # bf16 MXU operands: weights are resident in VMEM as bf16 (half the footprint),
    # activations are cast right before each dot, accumulation stays f32.
    w1 = w1.astype(jnp.bfloat16)
    w2 = w2.astype(jnp.bfloat16)

    h_chunk = H if H <= 128 else min(h_chunk, H)

    try:
        vmem_cap = int(pltpu.get_tpu_info().vmem_capacity_bytes)
    except Exception:
        vmem_cap = 64 * 1024 * 1024          # v7x per-TC worst case
    budget = int(vmem_cap * 0.7)
    vmem_limit = max(32 * 2**20, int(min(vmem_cap * 0.9, 100 * 2**20)))

    weights_bytes = 2 * (C * H + H * C) + 4 * (4 * C + H + C)

    def _fused_est(bt):
        blk = bt * N * C * 4
        # in+out (double-buffered) + f32 temporaries + live hidden chunk + weights
        return 4 * blk + 5 * blk + bt * N * h_chunk * 4 + weights_bytes

    if force_ntile is None:
        # Pack several batch elements per grid step when N is small: fills MXU rows
        # and amortizes per-grid-step overhead.
        bt = 1
        if N < 256:
            for cand in range(min(B, max(1, 512 // max(N, 1))), 0, -1):
                if B % cand == 0 and _fused_est(cand) <= budget:
                    bt = cand
                    break
        if _fused_est(bt) <= budget:
            return _poolformer_fused(x, g1, b1, g2, b2, w1, c1, w2, c2,
                                     eps=eps, bt=bt, h_chunk=h_chunk,
                                     vmem_limit=vmem_limit)
        tn = _pick_tn(N, C, h_chunk, budget, weights_bytes)
    else:
        tn = int(force_ntile)

    assert N % tn == 0, "sequence tile must divide N"
    return _poolformer_tiled(x, g1, b1, g2, b2, w1, c1, w2, c2,
                             eps=eps, tn=tn, h_chunk=h_chunk, vmem_limit=vmem_limit)


if __name__ == "__main__":
    key = jax.random.PRNGKey(0)
    B, N, C = 2, 16, 128          # batch, sequence length, channel dim (lane-dense C)
    H = int(C * 4.0)              # mlp_ratio = 4.0 -> 512
    eps = 1e-6

    ks = jax.random.split(key, 9)
    x = jax.random.normal(ks[0], (B, N, C), jnp.float32)
    g1 = 1.0 + 0.02 * jax.random.normal(ks[1], (C,), jnp.float32)
    b1 = 0.02 * jax.random.normal(ks[2], (C,), jnp.float32)
    g2 = 1.0 + 0.02 * jax.random.normal(ks[3], (C,), jnp.float32)
    b2 = 0.02 * jax.random.normal(ks[4], (C,), jnp.float32)
    w1 = 0.05 * jax.random.normal(ks[5], (C, H), jnp.float32)   # fc1.weight.T
    c1 = 0.02 * jax.random.normal(ks[6], (H,), jnp.float32)     # fc1.bias
    w2 = 0.05 * jax.random.normal(ks[7], (H, C), jnp.float32)   # fc2.weight.T
    c2 = 0.02 * jax.random.normal(ks[8], (C,), jnp.float32)     # fc2.bias

    # Exercise both code paths: fused (auto, with batch packing) and N-tiled two-pass.
    out_fused = poolformer_block(x, g1, b1, g2, b2, w1, c1, w2, c2, eps=eps)
    out_tiled = poolformer_block(x, g1, b1, g2, b2, w1, c1, w2, c2, eps=eps,
                                 force_ntile=8)
    out_fused, out_tiled = jax.block_until_ready((out_fused, out_tiled))

    # Pure-JAX reference mirroring the kernel's precision choices
    # (bf16 MXU operands with f32 accumulation, tanh GELU, f32 LayerNorm).
    def ln_ref(v, g, b):
        mean = jnp.mean(v, axis=-1, keepdims=True)
        d = v - mean
        var = jnp.sum(d * d, axis=-1, keepdims=True) / (C - 1)
        return g * d / (jnp.sqrt(var) + eps) + b

    y1 = ln_ref(x, g1, b1)
    x1 = x + jnp.mean(y1, axis=1, keepdims=True)
    y2 = ln_ref(x1, g2, b2)
    h = jnp.dot(y2.reshape(B * N, C).astype(jnp.bfloat16), w1.astype(jnp.bfloat16),
                preferred_element_type=jnp.float32) + c1
    h = _gelu_tanh(h)
    m = jnp.dot(h.astype(jnp.bfloat16), w2.astype(jnp.bfloat16),
                preferred_element_type=jnp.float32) + c2
    ref = x1 + m.reshape(B, N, C)

    assert out_fused.shape == x.shape and out_fused.dtype == x.dtype
    assert out_tiled.shape == x.shape and out_tiled.dtype == x.dtype
    for name, out in (("fused", out_fused), ("ntiled", out_tiled)):
        err = float(jnp.max(jnp.abs(out - ref)))
        assert jnp.allclose(out, ref, atol=1e-2, rtol=1e-2), (
            f"{name} mismatch vs reference: max|diff|={err}")
    print("KERNEL_OK")
</pallas_src>

<mosaic_0001>
module attributes {stable_mosaic.version = 11 : i64} {
  func.func @_fused_kernel(%arg0: i32, %arg1: memref<2x16x128xf32, #tpu.memory_space<vmem>>, %arg2: memref<1x128xf32, #tpu.memory_space<vmem>>, %arg3: memref<1x128xf32, #tpu.memory_space<vmem>>, %arg4: memref<1x128xf32, #tpu.memory_space<vmem>>, %arg5: memref<1x128xf32, #tpu.memory_space<vmem>>, %arg6: memref<128x512xbf16, #tpu.memory_space<vmem>>, %arg7: memref<1x512xf32, #tpu.memory_space<vmem>>, %arg8: memref<512x128xbf16, #tpu.memory_space<vmem>>, %arg9: memref<1x128xf32, #tpu.memory_space<vmem>>, %arg10: memref<2x16x128xf32, #tpu.memory_space<vmem>>) attributes {dimension_semantics = [#tpu.dimension_semantics<parallel>], iteration_bounds = array<i64: 1>, scalar_prefetch = 0 : i64, scratch_operands = 0 : i64, tpu.core_type = #tpu.core_type<tc>, window_params = [{transform_indices = @transform_0, window_bounds = array<i64: 2, 16, 128>}, {pipeline_mode = #tpu.pipeline_mode<synchronous>, transform_indices = @transform_1, window_bounds = array<i64: 1, 128>}, {pipeline_mode = #tpu.pipeline_mode<synchronous>, transform_indices = @transform_2, window_bounds = array<i64: 1, 128>}, {pipeline_mode = #tpu.pipeline_mode<synchronous>, transform_indices = @transform_3, window_bounds = array<i64: 1, 128>}, {pipeline_mode = #tpu.pipeline_mode<synchronous>, transform_indices = @transform_4, window_bounds = array<i64: 1, 128>}, {pipeline_mode = #tpu.pipeline_mode<synchronous>, transform_indices = @transform_5, window_bounds = array<i64: 128, 512>}, {pipeline_mode = #tpu.pipeline_mode<synchronous>, transform_indices = @transform_6, window_bounds = array<i64: 1, 512>}, {pipeline_mode = #tpu.pipeline_mode<synchronous>, transform_indices = @transform_7, window_bounds = array<i64: 512, 128>}, {pipeline_mode = #tpu.pipeline_mode<synchronous>, transform_indices = @transform_8, window_bounds = array<i64: 1, 128>}, {transform_indices = @transform_9, window_bounds = array<i64: 2, 16, 128>}]} {
    %c0 = arith.constant 0 : index
    %c0_0 = arith.constant 0 : index
    %c0_1 = arith.constant 0 : index
    %0 = vector.load %arg1[%c0, %c0_0, %c0_1] : memref<2x16x128xf32, #tpu.memory_space<vmem>>, vector<2x16x128xf32>
    %c0_2 = arith.constant 0 : index
    %c0_3 = arith.constant 0 : index
    %1 = vector.load %arg2[%c0_2, %c0_3] : memref<1x128xf32, #tpu.memory_space<vmem>>, vector<1x128xf32>
    %c0_4 = arith.constant 0 : index
    %c0_5 = arith.constant 0 : index
    %2 = vector.load %arg3[%c0_4, %c0_5] : memref<1x128xf32, #tpu.memory_space<vmem>>, vector<1x128xf32>
    %cst = arith.constant dense<0.000000e+00> : vector<2x16xf32>
    %3 = vector.multi_reduction <add>, %0, %cst [2] : vector<2x16x128xf32> to vector<2x16xf32>
    %4 = vector.shape_cast %3 : vector<2x16xf32> to vector<2x16x1xf32>
    %cst_6 = arith.constant 1.280000e+02 : f32
    %5 = vector.broadcast %cst_6 : f32 to vector<2x16x1xf32>
    %6 = arith.divf %4, %5 : vector<2x16x1xf32>
    %7 = vector.broadcast %6 : vector<2x16x1xf32> to vector<2x16x128xf32>
    %8 = arith.subf %0, %7 : vector<2x16x128xf32>
    %9 = arith.mulf %8, %8 : vector<2x16x128xf32>
    %cst_7 = arith.constant dense<0.000000e+00> : vector<2x16xf32>
    %10 = vector.multi_reduction <add>, %9, %cst_7 [2] : vector<2x16x128xf32> to vector<2x16xf32>
    %11 = vector.shape_cast %10 : vector<2x16xf32> to vector<2x16x1xf32>
    %cst_8 = arith.constant 0.00787401571 : f32
    %12 = vector.broadcast %cst_8 : f32 to vector<2x16x1xf32>
    %13 = arith.mulf %11, %12 : vector<2x16x1xf32>
    %14 = math.sqrt %13 : vector<2x16x1xf32>
    %cst_9 = arith.constant 9.99999997E-7 : f32
    %15 = vector.broadcast %cst_9 : f32 to vector<2x16x1xf32>
    %16 = arith.addf %14, %15 : vector<2x16x1xf32>
    %17 = tpu.reciprocal %16 {approx = true} : vector<2x16x1xf32> -> vector<2x16x1xf32>
    %18 = vector.broadcast %17 : vector<2x16x1xf32> to vector<2x16x128xf32>
    %19 = arith.mulf %8, %18 : vector<2x16x128xf32>
    %20 = vector.shape_cast %1 : vector<1x128xf32> to vector<1x1x128xf32>
    %21 = vector.broadcast %20 : vector<1x1x128xf32> to vector<2x16x128xf32>
    %22 = arith.mulf %21, %19 : vector<2x16x128xf32>
    %23 = vector.shape_cast %2 : vector<1x128xf32> to vector<1x1x128xf32>
    %24 = vector.broadcast %23 : vector<1x1x128xf32> to vector<2x16x128xf32>
    %25 = arith.addf %22, %24 : vector<2x16x128xf32>
    %cst_10 = arith.constant dense<0.000000e+00> : vector<2x128xf32>
    %26 = vector.multi_reduction <add>, %25, %cst_10 [1] : vector<2x16x128xf32> to vector<2x128xf32>
    %27 = vector.shape_cast %26 : vector<2x128xf32> to vector<2x1x128xf32>
    %cst_11 = arith.constant 1.600000e+01 : f32
    %28 = vector.broadcast %cst_11 : f32 to vector<2x1x128xf32>
    %29 = arith.divf %27, %28 : vector<2x1x128xf32>
    %30 = vector.broadcast %29 : vector<2x1x128xf32> to vector<2x16x128xf32>
    %31 = arith.addf %0, %30 : vector<2x16x128xf32>
    %c0_12 = arith.constant 0 : index
    %c0_13 = arith.constant 0 : index
    %32 = vector.load %arg4[%c0_12, %c0_13] : memref<1x128xf32, #tpu.memory_space<vmem>>, vector<1x128xf32>
    %c0_14 = arith.constant 0 : index
    %c0_15 = arith.constant 0 : index
    %33 = vector.load %arg5[%c0_14, %c0_15] : memref<1x128xf32, #tpu.memory_space<vmem>>, vector<1x128xf32>
    %cst_16 = arith.constant dense<0.000000e+00> : vector<2x16xf32>
    %34 = vector.multi_reduction <add>, %31, %cst_16 [2] : vector<2x16x128xf32> to vector<2x16xf32>
    %35 = vector.shape_cast %34 : vector<2x16xf32> to vector<2x16x1xf32>
    %cst_17 = arith.constant 1.280000e+02 : f32
    %36 = vector.broadcast %cst_17 : f32 to vector<2x16x1xf32>
    %37 = arith.divf %35, %36 : vector<2x16x1xf32>
    %38 = vector.broadcast %37 : vector<2x16x1xf32> to vector<2x16x128xf32>
    %39 = arith.subf %31, %38 : vector<2x16x128xf32>
    %40 = arith.mulf %39, %39 : vector<2x16x128xf32>
    %cst_18 = arith.constant dense<0.000000e+00> : vector<2x16xf32>
    %41 = vector.multi_reduction <add>, %40, %cst_18 [2] : vector<2x16x128xf32> to vector<2x16xf32>
    %42 = vector.shape_cast %41 : vector<2x16xf32> to vector<2x16x1xf32>
    %cst_19 = arith.constant 0.00787401571 : f32
    %43 = vector.broadcast %cst_19 : f32 to vector<2x16x1xf32>
    %44 = arith.mulf %42, %43 : vector<2x16x1xf32>
    %45 = math.sqrt %44 : vector<2x16x1xf32>
    %cst_20 = arith.constant 9.99999997E-7 : f32
    %46 = vector.broadcast %cst_20 : f32 to vector<2x16x1xf32>
    %47 = arith.addf %45, %46 : vector<2x16x1xf32>
    %48 = tpu.reciprocal %47 {approx = true} : vector<2x16x1xf32> -> vector<2x16x1xf32>
    %49 = vector.broadcast %48 : vector<2x16x1xf32> to vector<2x16x128xf32>
    %50 = arith.mulf %39, %49 : vector<2x16x128xf32>
    %51 = vector.shape_cast %32 : vector<1x128xf32> to vector<1x1x128xf32>
    %52 = vector.broadcast %51 : vector<1x1x128xf32> to vector<2x16x128xf32>
    %53 = arith.mulf %52, %50 : vector<2x16x128xf32>
    %54 = vector.shape_cast %33 : vector<1x128xf32> to vector<1x1x128xf32>
    %55 = vector.broadcast %54 : vector<1x1x128xf32> to vector<2x16x128xf32>
    %56 = arith.addf %53, %55 : vector<2x16x128xf32>
    %57 = vector.shape_cast %31 : vector<2x16x128xf32> to vector<32x128xf32>
    %58 = vector.shape_cast %56 : vector<2x16x128xf32> to vector<32x128xf32>
    %59 = arith.truncf %58 : vector<32x128xf32> to vector<32x128xbf16>
    %cst_21 = arith.constant 0.000000e+00 : f32
    %60 = vector.broadcast %cst_21 : f32 to vector<32x128xf32>
    %c0_22 = arith.constant 0 : index
    %c0_23 = arith.constant 0 : index
    %61 = vector.load %arg6[%c0_22, %c0_23] : memref<128x512xbf16, #tpu.memory_space<vmem>>, vector<128x512xbf16>
    %cst_24 = arith.constant dense<0.000000e+00> : vector<32x512xf32>
    %62 = tpu.matmul %59, %61, %cst_24 {dimension_numbers = #tpu.dot_dimension_numbers<[1], [0], [0], [1], [0, 0, 1, 1], [], []>} : vector<32x128xbf16>, vector<128x512xbf16>, vector<32x512xf32> -> vector<32x512xf32>
    %c0_25 = arith.constant 0 : index
    %c0_26 = arith.constant 0 : index
    %63 = vector.load %arg7[%c0_25, %c0_26] : memref<1x512xf32, #tpu.memory_space<vmem>>, vector<1x512xf32>
    %64 = vector.broadcast %63 : vector<1x512xf32> to vector<32x512xf32>
    %65 = arith.addf %62, %64 : vector<32x512xf32>
    %cst_27 = arith.constant 5.000000e-01 : f32
    %66 = vector.broadcast %cst_27 : f32 to vector<32x512xf32>
    %67 = arith.mulf %66, %65 : vector<32x512xf32>
    %68 = arith.mulf %65, %65 : vector<32x512xf32>
    %69 = arith.mulf %68, %65 : vector<32x512xf32>
    %cst_28 = arith.constant 4.471500e-02 : f32
    %70 = vector.broadcast %cst_28 : f32 to vector<32x512xf32>
    %71 = arith.mulf %70, %69 : vector<32x512xf32>
    %72 = arith.addf %65, %71 : vector<32x512xf32>
    %cst_29 = arith.constant 0.797884583 : f32
    %73 = vector.broadcast %cst_29 : f32 to vector<32x512xf32>
    %74 = arith.mulf %73, %72 : vector<32x512xf32>
    %75 = math.tanh %74 : vector<32x512xf32>
    %cst_30 = arith.constant 1.000000e+00 : f32
    %76 = vector.broadcast %cst_30 : f32 to vector<32x512xf32>
    %77 = arith.addf %76, %75 : vector<32x512xf32>
    %78 = arith.mulf %67, %77 : vector<32x512xf32>
    %79 = arith.truncf %78 : vector<32x512xf32> to vector<32x512xbf16>
    %c0_31 = arith.constant 0 : index
    %c0_32 = arith.constant 0 : index
    %80 = vector.load %arg8[%c0_31, %c0_32] : memref<512x128xbf16, #tpu.memory_space<vmem>>, vector<512x128xbf16>
    %cst_33 = arith.constant dense<0.000000e+00> : vector<32x128xf32>
    %81 = tpu.matmul %79, %80, %cst_33 {dimension_numbers = #tpu.dot_dimension_numbers<[1], [0], [0], [1], [0, 0, 1, 1], [], []>} : vector<32x512xbf16>, vector<512x128xbf16>, vector<32x128xf32> -> vector<32x128xf32>
    %82 = arith.addf %60, %81 : vector<32x128xf32>
    %83 = arith.addf %57, %82 : vector<32x128xf32>
    %c0_34 = arith.constant 0 : index
    %c0_35 = arith.constant 0 : index
    %84 = vector.load %arg9[%c0_34, %c0_35] : memref<1x128xf32, #tpu.memory_space<vmem>>, vector<1x128xf32>
    %85 = vector.broadcast %84 : vector<1x128xf32> to vector<32x128xf32>
    %86 = arith.addf %83, %85 : vector<32x128xf32>
    %87 = vector.shape_cast %86 : vector<32x128xf32> to vector<2x16x128xf32>
    %c0_36 = arith.constant 0 : index
    %c0_37 = arith.constant 0 : index
    %c0_38 = arith.constant 0 : index
    %88 = vector.load %arg10[%c0_36, %c0_37, %c0_38] : memref<2x16x128xf32, #tpu.memory_space<vmem>>, vector<2x16x128xf32>
    tpu.vector_store %arg10[%c0_36, %c0_37, %c0_38], %87 {strides = array<i32>} : memref<2x16x128xf32, #tpu.memory_space<vmem>>, vector<2x16x128xf32>,
    return
  }
  func.func @transform_0(%arg0: i32) -> (i32, i32, i32) {
    %c0_i32 = arith.constant 0 : i32
    %c0_i32_0 = arith.constant 0 : i32
    %c0_i32_1 = arith.constant 0 : i32
    return %arg0, %c0_i32, %c0_i32_0 : i32, i32, i32
  }
  func.func @transform_1(%arg0: i32) -> (i32, i32) {
    %c0_i32 = arith.constant 0 : i32
    %c0_i32_0 = arith.constant 0 : i32
    %c0_i32_1 = arith.constant 0 : i32
    return %c0_i32, %c0_i32_0 : i32, i32
  }
  func.func @transform_2(%arg0: i32) -> (i32, i32) {
    %c0_i32 = arith.constant 0 : i32
    %c0_i32_0 = arith.constant 0 : i32
    %c0_i32_1 = arith.constant 0 : i32
    return %c0_i32, %c0_i32_0 : i32, i32
  }
  func.func @transform_3(%arg0: i32) -> (i32, i32) {
    %c0_i32 = arith.constant 0 : i32
    %c0_i32_0 = arith.constant 0 : i32
    %c0_i32_1 = arith.constant 0 : i32
    return %c0_i32, %c0_i32_0 : i32, i32
  }
  func.func @transform_4(%arg0: i32) -> (i32, i32) {
    %c0_i32 = arith.constant 0 : i32
    %c0_i32_0 = arith.constant 0 : i32
    %c0_i32_1 = arith.constant 0 : i32
    return %c0_i32, %c0_i32_0 : i32, i32
  }
  func.func @transform_5(%arg0: i32) -> (i32, i32) {
    %c0_i32 = arith.constant 0 : i32
    %c0_i32_0 = arith.constant 0 : i32
    %c0_i32_1 = arith.constant 0 : i32
    return %c0_i32, %c0_i32_0 : i32, i32
  }
  func.func @transform_6(%arg0: i32) -> (i32, i32) {
    %c0_i32 = arith.constant 0 : i32
    %c0_i32_0 = arith.constant 0 : i32
    %c0_i32_1 = arith.constant 0 : i32
    return %c0_i32, %c0_i32_0 : i32, i32
  }
  func.func @transform_7(%arg0: i32) -> (i32, i32) {
    %c0_i32 = arith.constant 0 : i32
    %c0_i32_0 = arith.constant 0 : i32
    %c0_i32_1 = arith.constant 0 : i32
    return %c0_i32, %c0_i32_0 : i32, i32
  }
  func.func @transform_8(%arg0: i32) -> (i32, i32) {
    %c0_i32 = arith.constant 0 : i32
    %c0_i32_0 = arith.constant 0 : i32
    %c0_i32_1 = arith.constant 0 : i32
    return %c0_i32, %c0_i32_0 : i32, i32
  }
  func.func @transform_9(%arg0: i32) -> (i32, i32, i32) {
    %c0_i32 = arith.constant 0 : i32
    %c0_i32_0 = arith.constant 0 : i32
    %c0_i32_1 = arith.constant 0 : i32
    return %arg0, %c0_i32, %c0_i32_0 : i32, i32, i32
  }
}

</mosaic_0001>

<bundles_post_ra>
// kernel: tpu_custom_call.1
= control target key start
LH: loop header
LB: loop body
LE: loop exit
PB: predicated region body
PF: predicated region fallthrough
CT: control target
= control target key end

     0   :  { %14 = vsyncpa [#allocation3], 0  ;;  %s2095_s0 = inlined_call_operand.hbm [shape: f32[2,16,128], index: 0, kind: input, shape index: {}]   ;;  %s2096_s1 = inlined_call_operand.hbm [shape: f32[1,128], index: 1, kind: input, shape index: {}]   ;;  %s2097_s2 = inlined_call_operand.vmem [shape: f32[1,128], index: 2, kind: input, shape index: {}]   ;;  %s2098_s3 = inlined_call_operand.hbm [shape: f32[1,128], index: 3, kind: input, shape index: {}]   ;;  %s2099_s4 = inlined_call_operand.hbm [shape: f32[1,128], index: 4, kind: input, shape index: {}]   ;;  %s2100_s5 = inlined_call_operand.hbm [shape: bf16[128,512], index: 5, kind: input, shape index: {}]   ;;  %s2101_s6 = inlined_call_operand.vmem [shape: f32[1,512], index: 6, kind: input, shape index: {}]   ;;  %s2102_s7 = inlined_call_operand.hbm [shape: bf16[512,128], index: 7, kind: input, shape index: {}]   ;;  %s2103_s8 = inlined_call_operand.vmem [shape: f32[1,128], index: 8, kind: input, shape index: {}]   ;;  %s2104_s9 = inlined_call_operand.hbm [shape: f32[2,16,128], index: 9, kind: output, shape index: {}]  }
   0x1   :  { %15 = vsyncpa [#allocation6], 0 }
   0x2   :  { %16 = vsyncpa [#allocation9], 0 }
   0x3   :  { %17 = vsyncpa [#allocation12], 0  ;;  %s37_s11 = sshll.u32 %s2096_s1, 4  ;;  %s38_s11 = int_to_ptr.hbm [resolvable:$true] %s37_s11 }
   0x4   :  { %18 = vsyncpa [#allocation4], 0  ;;  %s1763_s12 = smov [#allocation5]   ;;  %s61_s16 = sshll.u32 %s2099_s4, 4  ;;  %s62_s16 = int_to_ptr.hbm [resolvable:$true] %s61_s16 }
   0x5   :  { %s39_s13 = sshll.u32 %s1763_s12, 4  ;;  %s1764_s17 = smov [#allocation8]   ;;  %s40_s13 = int_to_ptr.vmem [resolvable:$true] %s39_s13 }
   0x6   :  { %42 = dma.hbm_to_vmem [thread:$0]  %s38_s11, 16, %s40_s13, [#allocation6]  }
   0x7   :  { %s63_s18 = sshll.u32 %s1764_s17, 4  ;;  %s23_s21 = sshll.u32 %s2095_s0, 4  ;;  %s64_s18 = int_to_ptr.vmem [resolvable:$true] %s63_s18  ;;  %s24_s21 = int_to_ptr.hbm [resolvable:$true] %s23_s21 }
   0x8   :  { %66 = dma.hbm_to_vmem [thread:$0]  %s62_s16, 16, %s64_s18, [#allocation9]  }
   0x9   :  { %s1765_s1 = smov [#allocation2]   ;;  %s50_s25 = sshll.u32 %s2098_s3, 4  ;;  %s51_s25 = int_to_ptr.hbm [resolvable:$true] %s50_s25 }
   0xa   :  { %s25_s22 = sshll.u32 %s1765_s1, 4  ;;  %s1766_s26 = smov 128   ;;  %s26_s22 = int_to_ptr.vmem [resolvable:$true] %s25_s22 }
   0xb   :  { %s1767_s4 = smov 8   ;;  %s1768_s27 = smov [#allocation7]  }
   0xc   :  { %31 = dma.hbm_to_vmem [thread:$0]  %s24_s21, 512, %s26_s22, [#allocation3], %s1766_s26, %s1766_s26, %s1767_s4  }
   0xd   :  { %s52_s28 = sshll.u32 %s1768_s27, 4  ;;  %s71_s30 = sshll.u32 %s2100_s5, 4  ;;  %s53_s28 = int_to_ptr.vmem [resolvable:$true] %s52_s28  ;;  %s72_s30 = int_to_ptr.hbm [resolvable:$true] %s71_s30 }
   0xe   :  { %55 = dma.hbm_to_vmem [thread:$0]  %s51_s25, 16, %s53_s28, [#allocation6]  }
   0xf   :  { %s1769_s10 = smov [#allocation10]   ;;  %s86_s13 = sshll.u32 %s2102_s7, 4  ;;  %s87_s13 = int_to_ptr.hbm [resolvable:$true] %s86_s13 }
  0x10   :  { %s73_s11 = sshll.u32 %s1769_s10, 4  ;;  %s1770_s14 = smov 256   ;;  %s74_s11 = int_to_ptr.vmem [resolvable:$true] %s73_s11 }
  0x11   :  { %s1771_s15 = smov 16   ;;  %s1772_s16 = smov [#allocation11]  }
  0x12   :  { %79 = dma.hbm_to_vmem [thread:$0]  %s72_s30, 4096, %s74_s11, [#allocation9], %s1770_s14, %s1770_s14, %s1771_s15  }
  0x13   :  { %s88_s17 = sshll.u32 %s1772_s16, 4  ;;  %s1773_s18 = smov 64   ;;  %s89_s17 = int_to_ptr.vmem [resolvable:$true] %s88_s17 }
  0x14   :  { %s1774_s19 = smov 4  }
  0x15   :  { %94 = dma.hbm_to_vmem [thread:$0]  %s87_s13, 4096, %s89_s17, [#allocation12], %s1773_s18, %s1773_s18, %s1774_s19  }
  0x16   :  { %1753 = dma.done.wait [#allocation3], 512  }
  0x17   :  { %1754 = vsyncadd [#allocation3], 4294966784 }
  0x18   :  { %1755 = dma.done.wait [#allocation6], 32  }
  0x19   :  { %1756 = vsyncadd [#allocation6], 4294967264 }
  0x1a   :  { %1757 = dma.done.wait [#allocation9], 4112  }
  0x1b   :  { %1758 = vsyncadd [#allocation9], 4294963184 }
  0x1c   :  { %1759 = dma.done.wait [#allocation12], 4096  }
  0x1d   :  { %1760 = vsyncadd [#allocation12], 4294963200  ;;  %v1849_v0 = vld [vmem:[#allocation2 + $0x10] sm:$0xff]  ;;  %v1851_v1 = vld [vmem:[#allocation2] sm:$0xff]  ;;  %v1775_v4 = vmov 128.0   ;;  %s1161_s24 = sshll.u32 %s2104_s9, 4  ;;  %s1162_s24 = int_to_ptr.hbm [resolvable:$true] %s1161_s24 }
  0x1e   :  { %131 = vadd.xlane.f32.xlu1 %v1849_v0  ;;  %127 = vadd.xlane.f32.xlu0 %v1851_v1  ;;  %v1855_v2 = vld [vmem:[#allocation2 + $0x18] sm:$0xff]  ;;  %v1857_v3 = vld [vmem:[#allocation2 + $0x8] sm:$0xff]  ;;  %1517 = vrcp.f32 %v1775_v4 }
  0x24   :  { %v1518_v5 = vpop.eup %1517 }
  0x25   :  { %v136_v6 = vmul.f32 128.0, %v1518_v5  ;;  %vm140_vm0 = vweird.f32 %v1518_v5 }
  0x26   :  { %133 = vadd.xlane.f32.xlu1 %v1855_v2  ;;  %129 = vadd.xlane.f32.xlu0 %v1857_v3 }
  0x27   :  { %v137_v7 = vsub.f32 1.0, %v136_v6 }
  0x29   :  { %v138_v8 = vmul.f32 %v1518_v5, %v137_v7 }
  0x2b   :  { %v139_v9 = vadd.f32 %v1518_v5, %v138_v8 }
  0x2d   :  { %v1861_v10 = vsel %vm140_vm0, %v1518_v5, %v139_v9 }
  0x91   :  { %v132_v11 = vpop.xlane.xlu1 %131  ;;  %v128_v12 = vpop.xlane.xlu0 %127 }
  0x92   :  { %v144_v13 = vmul.f32 %v1861_v10, %v132_v11  ;;  %v142_v14 = vmul.f32 %v1861_v10, %v128_v12 }
  0x94   :  { %v1866_v15 = vsub.f32 %v1849_v0, %v144_v13  ;;  %v1869_v16 = vsub.f32 %v1851_v1, %v142_v14 }
  0x96   :  { %v152_v17 = vmul.f32 %v1866_v15, %v1866_v15  ;;  %v150_v18 = vmul.f32 %v1869_v16, %v1869_v16 }
  0x98   :  { %158 = vadd.xlane.f32.xlu0 %v152_v17  ;;  %154 = vadd.xlane.f32.xlu2 %v150_v18 }
  0x99   :  { %v134_v19 = vpop.xlane.xlu1 %133  ;;  %v130_v20 = vpop.xlane.xlu0 %129 }
  0x9a   :  { %v145_v21 = vmul.f32 %v1861_v10, %v134_v19  ;;  %v143_v22 = vmul.f32 %v1861_v10, %v130_v20 }
  0x9c   :  { %v1878_v23 = vsub.f32 %v1855_v2, %v145_v21  ;;  %v1881_v24 = vsub.f32 %v1857_v3, %v143_v22  ;;  %v1776_v22 = vmov 16.0  }
  0x9e   :  { %v153_v25 = vmul.f32 %v1878_v23, %v1878_v23  ;;  %v151_v26 = vmul.f32 %v1881_v24, %v1881_v24 }
  0xa0   :  { %160 = vadd.xlane.f32.xlu1 %v153_v25  ;;  %156 = vadd.xlane.f32.xlu2 %v151_v26 }
 0x10b   :  { %v155_v27 = vpop.xlane.xlu2 %154  ;;  %v159_v28 = vpop.xlane.xlu0 %158 }
 0x10c   :  { %v162_v29 = vmul.f32 0.007874016, %v155_v27  ;;  %v164_v30 = vmul.f32 0.007874016, %v159_v28  ;;  %v1512_v27 = vld [vmem:[#allocation5] ss:$0 sm:$0xff] }
 0x10e   :  { %1519 = vrsqrt.f32 %v162_v29  ;;  %vm173_vm1 = vcmp.eq.f32.partialorder %v162_v29, inf  ;;  %vm175_vm2 = vcmp.eq.f32.partialorder %v162_v29, 0.0  ;;  %v176_v53 = vand.u32 2147483648, %v162_v29 }
 0x10f   :  { %1521 = vrsqrt.f32 %v164_v30  ;;  %vm197_vm3 = vcmp.eq.f32.partialorder %v164_v30, inf  ;;  %v200_v57 = vand.u32 2147483648, %v164_v30  ;;  %vm199_vm4 = vcmp.eq.f32.partialorder %v164_v30, 0.0 }
 0x113   :  { %v161_v31 = vpop.xlane.xlu1 %160  ;;  %v157_v32 = vpop.xlane.xlu2 %156 }
 0x114   :  { %v1520_v33 = vpop.eup %1519  ;;  %v165_v34 = vmul.f32 0.007874016, %v161_v31  ;;  %v163_v35 = vmul.f32 0.007874016, %v157_v32 }
 0x115   :  { %v1522_v36 = vpop.eup %1521  ;;  %v167_v37 = vmul.f32 %v1520_v33, %v162_v29 }
 0x116   :  { %v191_v38 = vmul.f32 %v1522_v36, %v164_v30  ;;  %1523 = vrsqrt.f32 %v165_v34  ;;  %vm209_vm5 = vcmp.eq.f32.partialorder %v165_v34, inf  ;;  %vm211_vm6 = vcmp.eq.f32.partialorder %v165_v34, 0.0 }
 0x117   :  { %v168_v39 = vmul.f32 %v1520_v33, %v167_v37  ;;  %1525 = vrsqrt.f32 %v163_v35  ;;  %v212_v11 = vand.u32 2147483648, %v165_v34  ;;  %vm185_vm7 = vcmp.eq.f32.partialorder %v163_v35, inf }
 0x118   :  { %v192_v40 = vmul.f32 %v1522_v36, %v191_v38  ;;  %v188_v14 = vand.u32 2147483648, %v163_v35  ;;  %vm187_vm8 = vcmp.eq.f32.partialorder %v163_v35, 0.0 }
 0x119   :  { %v169_v41 = vmul.f32 0.5, %v168_v39 }
 0x11a   :  { %v193_v42 = vmul.f32 0.5, %v192_v40 }
 0x11b   :  { %v170_v43 = vsub.f32 1.5, %v169_v41 }
 0x11c   :  { %v1524_v44 = vpop.eup %1523  ;;  %v194_v45 = vsub.f32 1.5, %v193_v42 }
 0x11d   :  { %v1526_v46 = vpop.eup %1525  ;;  %v171_v47 = vmul.f32 %v1520_v33, %v170_v43  ;;  %v203_v48 = vmul.f32 %v1524_v44, %v165_v34  ;;  %v1513_v33 = vld [vmem:[%s2097_s2] ss:$0 sm:$0xff] }
 0x11e   :  { %v195_v49 = vmul.f32 %v1522_v36, %v194_v45  ;;  %v179_v50 = vmul.f32 %v1526_v46, %v163_v35 }
 0x11f   :  { %v172_v51 = vmul.f32 %v171_v47, %v162_v29  ;;  %v204_v52 = vmul.f32 %v1524_v44, %v203_v48 }
 0x120   :  { %v196_v54 = vmul.f32 %v195_v49, %v164_v30  ;;  %v180_v55 = vmul.f32 %v1526_v46, %v179_v50 }
 0x121   :  { %v174_v56 = vsel %vm173_vm1, %v162_v29, %v172_v51  ;;  %v205_v58 = vmul.f32 0.5, %v204_v52 }
 0x122   :  { %v177_v59 = vsel %vm175_vm2, %v176_v53, %v174_v56  ;;  %v198_v60 = vsel %vm197_vm3, %v164_v30, %v196_v54  ;;  %v181_v61 = vmul.f32 0.5, %v180_v55 }
 0x123   :  { %v201_v62 = vsel %vm199_vm4, %v200_v57, %v198_v60  ;;  %v206_v63 = vsub.f32 1.5, %v205_v58  ;;  %v214_v5 = vadd.f32 1e-06, %v177_v59 }
 0x124   :  { %v182_v4 = vsub.f32 1.5, %v181_v61  ;;  %v216_v6 = vadd.f32 1e-06, %v201_v62 }
 0x125   :  { %v207_v7 = vmul.f32 %v1524_v44, %v206_v63 }
 0x126   :  { %v183_v8 = vmul.f32 %v1526_v46, %v182_v4  ;;  %1527 = vrcp.f32 %v216_v6 }
 0x127   :  { %v208_v9 = vmul.f32 %v207_v7, %v165_v34  ;;  %1529 = vrcp.f32 %v214_v5 }
 0x128   :  { %v184_v12 = vmul.f32 %v183_v8, %v163_v35  ;;  %1531 = vrcp.f32 %v1776_v22  ;;  %v1461_v22 = vld [vmem:[#allocation10 + $0xe4] sm:$0xf] }
 0x129   :  { %v210_v13 = vsel %vm209_vm5, %v165_v34, %v208_v9 }
 0x12a   :  { %v213_v17 = vsel %vm211_vm6, %v212_v11, %v210_v13  ;;  %v186_v18 = vsel %vm185_vm7, %v163_v35, %v184_v12 }
 0x12b   :  { %v189_v19 = vsel %vm187_vm8, %v188_v14, %v186_v18  ;;  %v217_v20 = vadd.f32 1e-06, %v213_v17 }
 0x12c   :  { %v215_v21 = vadd.f32 1e-06, %v189_v19  ;;  %v1528_v25 = vpop.eup %1527 }
 0x12d   :  { %1533 = vrcp.f32 %v217_v20  ;;  %v1530_v26 = vpop.eup %1529  ;;  %v224_v28 = vmul.f32 %v1528_v25, %v1866_v15  ;;  %v1291_v20 = vld [vmem:[#allocation10 + $0xe0] sm:$0xf] }
 0x12e   :  { %1535 = vrcp.f32 %v215_v21  ;;  %v222_v29 = vmul.f32 %v1530_v26, %v1869_v16  ;;  %v1532_v30 = vpop.eup %1531  ;;  %v1463_v21 = vld [vmem:[#allocation10 + $0xec] sm:$0xf0]  ;;  %v1293_v26 = vld [vmem:[#allocation10 + $0xf0] sm:$0xf0] }
 0x12f   :  { %v231_v35 = vmul.f32 %v1512_v27, %v224_v28  ;;  %v255_v38 = vmul.f32 16.0, %v1532_v30  ;;  %vm259_vm9 = vweird.f32 %v1532_v30  ;;  %v1292_v25 = vor.u32 %v1463_v21, %v1291_v20  ;;  %v1464_v28 = vld [vmem:[#allocation10 + $0xf4] sm:$0xf0]  ;;  %v1446_v21 = vld [vmem:[#allocation10 + $0x6c] sm:$0xf] }
 0x130   :  { %v229_v37 = vmul.f32 %v1512_v27, %v222_v29  ;;  %v1296_v29 = vor.u32 %v1461_v22, %v1293_v26  ;;  %v1237_v22 = vld [vmem:[#allocation10 + $0x78] sm:$0xf0]  ;;  %v1211_v26 = vld [vmem:[#allocation10 + $0x40] sm:$0xf] }
 0x131   :  { %v238_v41 = vadd.f32 %v1513_v33, %v231_v35  ;;  %v256_v43 = vsub.f32 1.0, %v255_v38  ;;  %579 = vmatpush.bf16.msra.mxu0 %v1292_v25  ;;  %v1457_v35 = vld [vmem:[#allocation10 + $0xc4] sm:$0xf]  ;;  %v1283_v38 = vld [vmem:[#allocation10 + $0xc8] sm:$0xf]  ;;  %v1240_v25 = vor.u32 %v1446_v21, %v1237_v22 }
 0x132   :  { %v236_v42 = vadd.f32 %v1513_v33, %v229_v37  ;;  %598 = vmatpush.bf16.msra.mxu1 %v1296_v29  ;;  %v1277_v37 = vld [vmem:[#allocation10 + $0xd0] sm:$0xf0] }
 0x133   :  { %v1534_v31 = vpop.eup %1533  ;;  %v257_v48 = vmul.f32 %v1532_v30, %v256_v43  ;;  %v1259_v43 = vld [vmem:[#allocation10 + $0xa0] sm:$0xf] }
 0x134   :  { %v1536_v32 = vpop.eup %1535  ;;  %v225_v34 = vmul.f32 %v1534_v31, %v1878_v23  ;;  %v1462_v31 = vld [vmem:[#allocation10 + $0xec] sm:$0xf] }
 0x135   :  { %v223_v36 = vmul.f32 %v1536_v32, %v1881_v24  ;;  %v258_v52 = vadd.f32 %v1532_v30, %v257_v48  ;;  %v1301_v32 = vld [vmem:[#allocation10 + $0xf8] sm:$0xf0]  ;;  %v1267_v48 = vld [vmem:[#allocation10 + $0xa8] sm:$0xf] }
 0x136   :  { %v232_v39 = vmul.f32 %v1512_v27, %v225_v34  ;;  %v1459_v34 = vld [vmem:[#allocation10 + $0xcc] sm:$0xf0] }
 0x137   :  { %v230_v40 = vmul.f32 %v1512_v27, %v223_v36  ;;  %v260_v56 = vsel %vm259_vm9, %v1532_v30, %v258_v52  ;;  %v1299_v27 = vld [vmem:[#allocation10 + $0xe8] sm:$0xf]  ;;  %v1269_v52 = vld [vmem:[#allocation10 + $0xb8] sm:$0xf0] }
 0x138   :  { %v239_v15 = vadd.f32 %v1513_v33, %v232_v39  ;;  %v1300_v30 = vor.u32 %v1464_v28, %v1299_v27  ;;  %v1460_v39 = vld [vmem:[#allocation10 + $0xd4] sm:$0xf0]  ;;  %v1443_v27 = vld [vmem:[#allocation10 + $0x4c] sm:$0xf0]  ;;  %v1441_v28 = vld [vmem:[#allocation10 + $0x44] sm:$0xf] }
 0x139   :  { %v237_v16 = vadd.f32 %v1513_v33, %v230_v40  ;;  %v1275_v33 = vld [vmem:[#allocation10 + $0xc0] sm:$0xf]  ;;  %v1280_v40 = vor.u32 %v1457_v35, %v1277_v37  ;;  %v1212_v29 = vor.u32 %v1443_v27, %v1211_v26  ;;  %v1221_v35 = vld [vmem:[#allocation10 + $0x58] sm:$0xf0] }
 0x13a   :  { %v247_v44 = vadd.f32 %v239_v15, %v238_v41  ;;  %617 = vmatpush.bf16.msra.mxu2 %v1300_v30  ;;  %v1276_v36 = vor.u32 %v1459_v34, %v1275_v33  ;;  %v1284_v41 = vor.u32 %v1460_v39, %v1283_v38  ;;  %v1458_v15 = vld [vmem:[#allocation10 + $0xcc] sm:$0xf]  ;;  %v1213_v30 = vld [vmem:[#allocation10 + $0x50] sm:$0xf0]  ;;  %v1439_v39 = vld [vmem:[#allocation10 + $0x2c] sm:$0xf0] }
 0x13b   :  { %v240_v45 = vadd.f32 %v237_v16, %v236_v42  ;;  %v1285_v42 = vld [vmem:[#allocation10 + $0xd8] sm:$0xf0]  ;;  %599 = vmatpush.bf16.msra.mxu1 %v1280_v40  ;;  %v1442_v34 = vld [vmem:[#allocation10 + $0x4c] sm:$0xf]  ;;  %v1437_v40 = vld [vmem:[#allocation10 + $0x24] sm:$0xf] }
 0x13c   :  { %v248_v46 = vrot.slane %v247_v44, 4  ;;  %580 = vmatpush.bf16.msra.mxu0 %v1276_v36  ;;  %v1288_v16 = vor.u32 %v1458_v15, %v1285_v42  ;;  %v1195_v36 = vld [vmem:[#allocation10 + $0x20] sm:$0xf]  ;;  %v1224_v38 = vor.u32 %v1442_v34, %v1221_v35 }
 0x13d   :  { %v241_v47 = vrot.slane %v240_v45, 4 }
 0x13e   :  { %v249_v49 = vadd.f32 %v248_v46, %v247_v44  ;;  %618 = vmatpush.bf16.msra.mxu2 %v1284_v41  ;;  %v1455_v44 = vld [vmem:[#allocation10 + $0xac] sm:$0xf0]  ;;  %v1197_v41 = vld [vmem:[#allocation10 + $0x30] sm:$0xf0] }
 0x13f   :  { %v242_v50 = vadd.f32 %v241_v47, %v240_v45  ;;  %v1453_v45 = vld [vmem:[#allocation10 + $0xa4] sm:$0xf]  ;;  %v1260_v46 = vor.u32 %v1455_v44, %v1259_v43  ;;  %v1261_v47 = vld [vmem:[#allocation10 + $0xb0] sm:$0xf0]  ;;  %v1196_v43 = vor.u32 %v1439_v39, %v1195_v36  ;;  %v1200_v44 = vor.u32 %v1437_v40, %v1197_v41 }
 0x140   :  { %v250_v23 = vrot.slane %v249_v49, 2 }
 0x141   :  { %v243_v51 = vrot.slane %v242_v50, 2  ;;  %581 = vmatpush.bf16.msra.mxu0 %v1260_v46  ;;  %v1440_v46 = vld [vmem:[#allocation10 + $0x34] sm:$0xf0] }
 0x142   :  { %v251_v24 = vadd.f32 %v250_v23, %v249_v49  ;;  %v1456_v49 = vld [vmem:[#allocation10 + $0xb4] sm:$0xf0] }
 0x143   :  { %v244_v53 = vadd.f32 %v243_v51, %v242_v50  ;;  %v1264_v50 = vor.u32 %v1453_v45, %v1261_v47  ;;  %v1268_v23 = vor.u32 %v1456_v49, %v1267_v48  ;;  %v1454_v51 = vld [vmem:[#allocation10 + $0xac] sm:$0xf]  ;;  %v1203_v45 = vld [vmem:[#allocation10 + $0x28] sm:$0xf] }
 0x144   :  { %v252_v54 = vrot.slane %v251_v24, 1  ;;  %v1204_v49 = vor.u32 %v1440_v46, %v1203_v45 }
 0x145   :  { %v245_v55 = vrot.slane %v244_v53, 1  ;;  %600 = vmatpush.bf16.msra.mxu1 %v1264_v50  ;;  %619 = vmatpush.bf16.msra.mxu2 %v1268_v23  ;;  %v1438_v50 = vld [vmem:[#allocation10 + $0x2c] sm:$0xf]  ;;  %v1205_v23 = vld [vmem:[#allocation10 + $0x38] sm:$0xf0] }
 0x146   :  { %v253_v57 = vadd.f32 %v252_v54, %v251_v24  ;;  %v1272_v24 = vor.u32 %v1454_v51, %v1269_v52  ;;  %v1451_v54 = vld [vmem:[#allocation10 + $0x8c] sm:$0xf0]  ;;  %v1179_v51 = vld [vmem:[#allocation10] sm:$0xf] }
 0x147   :  { %v246_v58 = vadd.f32 %v245_v55, %v244_v53  ;;  %v1243_v53 = vld [vmem:[#allocation10 + $0x80] sm:$0xf]  ;;  %v1449_v55 = vld [vmem:[#allocation10 + $0x84] sm:$0xf]  ;;  %v1435_v52 = vld [vmem:[#allocation10 + $0xc] sm:$0xf0] }
 0x148   :  { %v262_v59 = vmul.f32 %v260_v56, %v253_v57  ;;  %v1245_v57 = vld [vmem:[#allocation10 + $0x90] sm:$0xf0] }
 0x149   :  { %v261_v60 = vmul.f32 %v260_v56, %v246_v58  ;;  %v1244_v56 = vor.u32 %v1451_v54, %v1243_v53  ;;  %v1251_v58 = vld [vmem:[#allocation10 + $0x88] sm:$0xf]  ;;  %v1180_v53 = vor.u32 %v1435_v52, %v1179_v51  ;;  %v1433_v54 = vld [vmem:[#allocation10 + $0x4] sm:$0xf]  ;;  %v1514_v52 = vld [vmem:[#allocation7] ss:$0 sm:$0xff] }
 0x14a   :  { %v1895_v61 = vadd.f32 %v262_v59, %v1849_v0  ;;  %v1907_v4 = vadd.f32 %v262_v59, %v1855_v2  ;;  %v1452_v59 = vld [vmem:[#allocation10 + $0x94] sm:$0xf0] }
 0x14b   :  { %v1898_v62 = vadd.f32 %v261_v60, %v1857_v3  ;;  %v1901_v63 = vadd.f32 %v261_v60, %v1851_v1  ;;  %v1248_v60 = vor.u32 %v1449_v55, %v1245_v57  ;;  %582 = vmatpush.bf16.msra.mxu0 %v1244_v56  ;;  %v1181_v55 = vld [vmem:[#allocation10 + $0x10] sm:$0xf0]  ;;  %v1187_v57 = vld [vmem:[#allocation10 + $0x8] sm:$0xf] }
 0x14c   :  { %273 = vadd.xlane.f32.xlu1 %v1895_v61  ;;  %v1184_v56 = vor.u32 %v1433_v54, %v1181_v55 }
 0x14d   :  { %271 = vadd.xlane.f32.xlu0 %v1898_v62  ;;  %269 = vadd.xlane.f32.xlu2 %v1901_v63 }
 0x14e   :  { %601 = vmatpush.bf16.msra.mxu1 %v1248_v60 }
 0x155   :  { %275 = vadd.xlane.f32.xlu2 %v1907_v4 }
 0x1bf   :  { %v274_v5 = vpop.xlane.xlu1 %273 }
 0x1c0   :  { %v270_v0 = vpop.xlane.xlu2 %269  ;;  %v279_v6 = vmul.f32 %v274_v5, %v1861_v10  ;;  %v272_v3 = vpop.xlane.xlu0 %271  ;;  %v1252_v5 = vor.u32 %v1452_v59, %v1251_v58  ;;  %v1436_v58 = vld [vmem:[#allocation10 + $0x14] sm:$0xf0]  ;;  %v1434_v59 = vld [vmem:[#allocation10 + $0xc] sm:$0xf] }
 0x1c1   :  { %v277_v7 = vmul.f32 %v270_v0, %v1861_v10  ;;  %v278_v1 = vmul.f32 %v272_v3, %v1861_v10  ;;  %v1450_v0 = vld [vmem:[#allocation10 + $0x8c] sm:$0xf]  ;;  %v1188_v60 = vor.u32 %v1436_v58, %v1187_v57  ;;  %v1515_v57 = vld [vmem:[#allocation8] ss:$0 sm:$0xff] }
 0x1c2   :  { %v1914_v8 = vsub.f32 %v1895_v61, %v279_v6  ;;  %v1253_v6 = vld [vmem:[#allocation10 + $0x98] sm:$0xf0]  ;;  %620 = vmatpush.bf16.msra.mxu2 %v1252_v5 }
 0x1c3   :  { %v1917_v9 = vsub.f32 %v1901_v63, %v277_v7  ;;  %v1920_v2 = vsub.f32 %v1898_v62, %v278_v1  ;;  %v1256_v3 = vor.u32 %v1450_v0, %v1253_v6  ;;  %v1227_v7 = vld [vmem:[#allocation10 + $0x60] sm:$0xf]  ;;  %v1447_v1 = vld [vmem:[#allocation10 + $0x6c] sm:$0xf0]  ;;  %v1189_v5 = vld [vmem:[#allocation10 + $0x18] sm:$0xf0] }
 0x1c4   :  { %v287_v11 = vmul.f32 %v1914_v8, %v1914_v8  ;;  %v1192_v0 = vor.u32 %v1434_v59, %v1189_v5 }
 0x1c5   :  { %v285_v12 = vmul.f32 %v1917_v9, %v1917_v9  ;;  %v286_v13 = vmul.f32 %v1920_v2, %v1920_v2 }
 0x1c6   :  { %293 = vadd.xlane.f32.xlu2 %v287_v11  ;;  %v1445_v11 = vld [vmem:[#allocation10 + $0x64] sm:$0xf] }
 0x1c7   :  { %289 = vadd.xlane.f32.xlu0 %v285_v12  ;;  %291 = vadd.xlane.f32.xlu1 %v286_v13  ;;  %v1228_v12 = vor.u32 %v1447_v1, %v1227_v7  ;;  %v1229_v13 = vld [vmem:[#allocation10 + $0x70] sm:$0xf0] }
 0x1c8   :  { %v276_v14 = vpop.xlane.xlu2 %275 }
 0x1c9   :  { %v280_v17 = vmul.f32 %v276_v14, %v1861_v10  ;;  %v1304_v10 = vor.u32 %v1462_v31, %v1301_v32  ;;  %v1235_v14 = vld [vmem:[#allocation10 + $0x68] sm:$0xf]  ;;  %583 = vmatpush.bf16.msra.mxu0 %v1228_v12  ;;  %v1444_v32 = vld [vmem:[#allocation10 + $0x54] sm:$0xf0] }
 0x1ca   :  { %v1219_v31 = vld [vmem:[#allocation10 + $0x48] sm:$0xf] }
 0x1cb   :  { %v1930_v18 = vsub.f32 %v1907_v4, %v280_v17  ;;  %636 = vmatpush.bf16.msra.mxu3 %v1304_v10  ;;  %v1448_v17 = vld [vmem:[#allocation10 + $0x74] sm:$0xf0]  ;;  %v1216_v10 = vor.u32 %v1441_v28, %v1213_v30  ;;  %v1220_v33 = vor.u32 %v1444_v32, %v1219_v31 }
 0x1cc   :  { %v1236_v20 = vor.u32 %v1448_v17, %v1235_v14 }
 0x1cd   :  { %v288_v19 = vmul.f32 %v1930_v18, %v1930_v18  ;;  %584 = vmatpush.bf16.msra.mxu0 %v1212_v29 }
 0x1ce   :  { %621 = vmatpush.bf16.msra.mxu2 %v1236_v20 }
 0x1cf   :  { %295 = vadd.xlane.f32.xlu0 %v288_v19  ;;  %637 = vmatpush.bf16.msra.mxu3 %v1288_v16  ;;  %v1232_v19 = vor.u32 %v1445_v11, %v1229_v13 }
 0x1d1   :  { %602 = vmatpush.bf16.msra.mxu1 %v1232_v19  ;;  %585 = vmatpush.bf16.msra.mxu0 %v1196_v43 }
 0x1d2   :  { %622 = vmatpush.bf16.msra.mxu2 %v1220_v33 }
 0x1d3   :  { %638 = vmatpush.bf16.msra.mxu3 %v1272_v24  ;;  %v1208_v24 = vor.u32 %v1438_v50, %v1205_v23 }
 0x1d5   :  { %603 = vmatpush.bf16.msra.mxu1 %v1216_v10  ;;  %586 = vmatpush.bf16.msra.mxu0 %v1180_v53 }
 0x1d6   :  { %623 = vmatpush.bf16.msra.mxu2 %v1204_v49 }
 0x1d7   :  { %639 = vmatpush.bf16.msra.mxu3 %v1256_v3 }
 0x1d9   :  { %604 = vmatpush.bf16.msra.mxu1 %v1200_v44 }
 0x1da   :  { %624 = vmatpush.bf16.msra.mxu2 %v1188_v60 }
 0x1db   :  { %640 = vmatpush.bf16.msra.mxu3 %v1240_v25 }
 0x1dd   :  { %605 = vmatpush.bf16.msra.mxu1 %v1184_v56 }
 0x1df   :  { %641 = vmatpush.bf16.msra.mxu3 %v1224_v38 }
 0x1e3   :  { %642 = vmatpush.bf16.msra.mxu3 %v1208_v24 }
 0x1e7   :  { %643 = vmatpush.bf16.msra.mxu3 %v1192_v0 }
 0x239   :  { %v294_v37 = vpop.xlane.xlu2 %293 }
 0x23a   :  { %v1934_v15 = vmul.f32 0.007874016, %v294_v37  ;;  %v292_v42 = vpop.xlane.xlu1 %291  ;;  %v290_v16 = vpop.xlane.xlu0 %289 }
 0x23b   :  { %v1936_v47 = vmul.f32 0.007874016, %v292_v42  ;;  %v1938_v48 = vmul.f32 0.007874016, %v290_v16 }
 0x23c   :  { %1537 = vrsqrt.f32 %v1934_v15  ;;  %vm332_vm14 = vcmp.eq.f32.partialorder %v1934_v15, inf  ;;  %vm334_vm0 = vcmp.eq.f32.partialorder %v1934_v15, 0.0 }
 0x23d   :  { %1539 = vrsqrt.f32 %v1936_v47  ;;  %vm320_vm10 = vcmp.eq.f32.partialorder %v1936_v47, inf  ;;  %v323_v35 = vand.u32 2147483648, %v1936_v47  ;;  %vm308_vm11 = vcmp.eq.f32.partialorder %v1938_v48, inf }
 0x23e   :  { %1541 = vrsqrt.f32 %v1938_v48  ;;  %v311_v37 = vand.u32 2147483648, %v1938_v48  ;;  %vm322_vm12 = vcmp.eq.f32.partialorder %v1936_v47, 0.0  ;;  %vm310_vm13 = vcmp.eq.f32.partialorder %v1938_v48, 0.0 }
 0x242   :  { %v1538_v6 = vpop.eup %1537  ;;  %v296_v3 = vpop.xlane.xlu0 %295 }
 0x243   :  { %v1540_v7 = vpop.eup %1539  ;;  %v326_v1 = vmul.f32 %v1538_v6, %v1934_v15  ;;  %v300_v11 = vmul.f32 0.007874016, %v296_v3 }
 0x244   :  { %v1542_v12 = vpop.eup %1541  ;;  %v314_v13 = vmul.f32 %v1540_v7, %v1936_v47 }
 0x245   :  { %v327_v14 = vmul.f32 %v1538_v6, %v326_v1  ;;  %v302_v17 = vmul.f32 %v1542_v12, %v1938_v48  ;;  %1543 = vrsqrt.f32 %v300_v11  ;;  %vm344_vm15 = vcmp.eq.f32.partialorder %v300_v11, inf }
 0x246   :  { %v315_v19 = vmul.f32 %v1540_v7, %v314_v13  ;;  %v347_v23 = vand.u32 2147483648, %v300_v11  ;;  %vm346_vm1 = vcmp.eq.f32.partialorder %v300_v11, 0.0 }
 0x247   :  { %v328_v20 = vmul.f32 0.5, %v327_v14  ;;  %v303_v21 = vmul.f32 %v1542_v12, %v302_v17  ;;  %v1472_v17 = vld [vmem:[#allocation11 + $0x38] sm:$0xff] }
 0x248   :  { %v316_v22 = vmul.f32 0.5, %v315_v19  ;;  %v1480_v19 = vld [vmem:[#allocation11 + $0x78] sm:$0xff]  ;;  %1063 = vmatpush.bf16.msrb.mxu0 %v1472_v17 }
 0x249   :  { %v329_v25 = vsub.f32 1.5, %v328_v20  ;;  %v304_v26 = vmul.f32 0.5, %v303_v21  ;;  %1082 = vmatpush.bf16.msrb.mxu1 %v1480_v19  ;;  %v1471_v20 = vld [vmem:[#allocation11 + $0x30] sm:$0xff] }
 0x24a   :  { %v317_v27 = vsub.f32 1.5, %v316_v22  ;;  %v1479_v21 = vld [vmem:[#allocation11 + $0x70] sm:$0xff]  ;;  %v1496_v22 = vld [vmem:[#allocation11 + $0xf8] sm:$0xff] }
 0x24b   :  { %v1544_v28 = vpop.eup %1543  ;;  %v305_v29 = vsub.f32 1.5, %v304_v26  ;;  %v330_v32 = vmul.f32 %v1538_v6, %v329_v25  ;;  %1120 = vmatpush.bf16.msrb.mxu3 %v1496_v22  ;;  %v1478_v25 = vld [vmem:[#allocation11 + $0x68] sm:$0xff]  ;;  %v1487_v26 = vld [vmem:[#allocation11 + $0xb0] sm:$0xff] }
 0x24c   :  { %v318_v30 = vmul.f32 %v1540_v7, %v317_v27  ;;  %v338_v31 = vmul.f32 %v1544_v28, %v300_v11  ;;  %1064 = vmatpush.bf16.msrb.mxu0 %v1471_v20  ;;  %v1495_v27 = vld [vmem:[#allocation11 + $0xf0] sm:$0xff] }
 0x24d   :  { %v306_v10 = vmul.f32 %v1542_v12, %v305_v29  ;;  %v331_v40 = vmul.f32 %v330_v32, %v1934_v15  ;;  %1083 = vmatpush.bf16.msrb.mxu1 %v1479_v21  ;;  %v1477_v29 = vld [vmem:[#allocation11 + $0x60] sm:$0xff]  ;;  %v1468_v32 = vld [vmem:[#allocation11 + $0x18] sm:$0xff] }
 0x24e   :  { %v319_v33 = vmul.f32 %v318_v30, %v1936_v47  ;;  %v339_v34 = vmul.f32 %v1544_v28, %v338_v31  ;;  %v1486_v30 = vld [vmem:[#allocation11 + $0xa8] sm:$0xff] }
 0x24f   :  { %v307_v36 = vmul.f32 %v306_v10, %v1938_v48  ;;  %v333_v49 = vsel %vm332_vm14, %v1934_v15, %v331_v40  ;;  %1121 = vmatpush.bf16.msrb.mxu3 %v1495_v27  ;;  %v1494_v31 = vld [vmem:[#allocation11 + $0xe8] sm:$0xff]  ;;  %v1476_v10 = vld [vmem:[#allocation11 + $0x58] sm:$0xff] }
 0x250   :  { %v340_v38 = vmul.f32 0.5, %v339_v34  ;;  %v321_v39 = vsel %vm320_vm10, %v1936_v47, %v319_v33  ;;  %v335_v47 = vand.u32 2147483648, %v1934_v15  ;;  %v1485_v33 = vld [vmem:[#allocation11 + $0xa0] sm:$0xff]  ;;  %v1466_v40 = vld [vmem:[#allocation11 + $0x8] sm:$0xff] }
 0x251   :  { %v309_v41 = vsel %vm308_vm11, %v1938_v48, %v307_v36  ;;  %v324_v42 = vsel %vm322_vm12, %v323_v35, %v321_v39  ;;  %1084 = vmatpush.bf16.msrb.mxu1 %v1478_v25  ;;  %v1493_v34 = vld [vmem:[#allocation11 + $0xe0] sm:$0xff]  ;;  %v1467_v35 = vld [vmem:[#allocation11 + $0x10] sm:$0xff]  ;;  %v1492_v39 = vld [vmem:[#allocation11 + $0xd8] sm:$0xff] }
 0x252   :  { %v341_v16 = vsub.f32 1.5, %v340_v38  ;;  %v312_v43 = vsel %vm310_vm13, %v311_v37, %v309_v41  ;;  %v350_v44 = vadd.f32 1e-06, %v324_v42  ;;  %v336_v48 = vsel %vm334_vm0, %v335_v47, %v333_v49  ;;  %v1475_v36 = vld [vmem:[#allocation11 + $0x50] sm:$0xff]  ;;  %v409_v37 = vld [vmem:[%s2101_s6] sm:$0xf] }
 0x253   :  { %v349_v45 = vadd.f32 1e-06, %v312_v43  ;;  %v351_v58 = vadd.f32 1e-06, %v336_v48  ;;  %1122 = vmatpush.bf16.msrb.mxu3 %v1494_v31  ;;  %v1484_v38 = vld [vmem:[#allocation11 + $0x98] sm:$0xff]  ;;  %v1474_v41 = vld [vmem:[#allocation11 + $0x48] sm:$0xff] }
 0x254   :  { %v342_v46 = vmul.f32 %v1544_v28, %v341_v16  ;;  %1545 = vrcp.f32 %v350_v44  ;;  %v1469_v28 = vld [vmem:[#allocation11 + $0x20] sm:$0xff]  ;;  %v1968_v42 = vperm.slane %v409_v37, 0  ;;  %v1970_v16 = vperm.slane %v409_v37, 1  ;;  %v1483_v43 = vld [vmem:[#allocation11 + $0x90] sm:$0xff]  ;;  %v1482_v48 = vld [vmem:[#allocation11 + $0x88] sm:$0xff] }
 0x255   :  { %1547 = vrcp.f32 %v349_v45  ;;  %1085 = vmatpush.bf16.msrb.mxu1 %v1477_v29  ;;  %v1491_v44 = vld [vmem:[#allocation11 + $0xd0] sm:$0xff]  ;;  %v1465_v49 = vld [vmem:[#allocation11] sm:$0xff] }
 0x256   :  { %v343_v50 = vmul.f32 %v342_v46, %v300_v11  ;;  %v1473_v47 = vld [vmem:[#allocation11 + $0x40] sm:$0xff] }
 0x257   :  { %1123 = vmatpush.bf16.msrb.mxu3 %v1493_v34 }
 0x258   :  { %v345_v51 = vsel %vm344_vm15, %v300_v11, %v343_v50 }
 0x259   :  { %v348_v24 = vsel %vm346_vm1, %v347_v23, %v345_v51  ;;  %1086 = vmatpush.bf16.msrb.mxu1 %v1476_v10  ;;  %v1490_v51 = vld [vmem:[#allocation11 + $0xc8] sm:$0xff] }
 0x25a   :  { %v1546_v53 = vpop.eup %1545  ;;  %v352_v54 = vadd.f32 1e-06, %v348_v24 }
 0x25b   :  { %v1548_v55 = vpop.eup %1547  ;;  %v358_v56 = vmul.f32 %v1546_v53, %v1920_v2  ;;  %1124 = vmatpush.bf16.msrb.mxu3 %v1492_v39  ;;  %v1978_v53 = vperm.slane %v409_v37, 2 }
 0x25c   :  { %v357_v59 = vmul.f32 %v1548_v55, %v1917_v9  ;;  %1549 = vrcp.f32 %v352_v54  ;;  %v1980_v54 = vperm.slane %v409_v37, 3 }
 0x25d   :  { %v365_v60 = vmul.f32 %v1514_v52, %v358_v56  ;;  %1551 = vrcp.f32 %v351_v58  ;;  %1087 = vmatpush.bf16.msrb.mxu1 %v1475_v36  ;;  %v1489_v58 = vld [vmem:[#allocation11 + $0xc0] sm:$0xff] }
 0x25e   :  { %v364_v5 = vmul.f32 %v1514_v52, %v357_v59 }
 0x25f   :  { %v372_v0 = vadd.f32 %v1515_v57, %v365_v60  ;;  %1125 = vmatpush.bf16.msrb.mxu3 %v1491_v44 }
 0x260   :  { %v371_v15 = vadd.f32 %v1515_v57, %v364_v5 }
 0x261   :  { %1088 = vmatpush.bf16.msrb.mxu1 %v1474_v41 }
 0x262   :  { %v375_v6 = vpack.c.bf16 %v372_v0, %v371_v15  ;;  %v1550_v3 = vpop.eup %1549 }
 0x263   :  { %v1552_v7 = vpop.eup %1551  ;;  %v360_v1 = vmul.f32 %v1550_v3, %v1930_v18  ;;  %v1488_v18 = vld [vmem:[#allocation11 + $0xb8] sm:$0xff]  ;;  %1126 = vmatpush.bf16.msrb.mxu3 %v1490_v51 }
 0x264   :  { %587 = vmatmul.bf16.vlgmr.msra.gmra.mxu0 %v375_v6  ;;  %606 = vmatmul.bf16.vlgmr.msra.gmra.mxu1 %v375_v6  ;;  %v359_v2 = vmul.f32 %v1552_v7, %v1914_v8  ;;  %v1470_v8 = vld [vmem:[#allocation11 + $0x28] sm:$0xff] }
 0x265   :  { %625 = vmatmul.bf16.vlgmr.msra.gmra.mxu2 %v375_v6  ;;  %644 = vmatmul.bf16.vlgmr.msra.gmra.mxu3 %v375_v6  ;;  %v367_v11 = vmul.f32 %v1514_v52, %v360_v1 }
 0x266   :  { %v366_v12 = vmul.f32 %v1514_v52, %v359_v2  ;;  %1101 = vmatpush.bf16.msrb.mxu2 %v1488_v18  ;;  %1065 = vmatpush.bf16.msrb.mxu0 %v1470_v8 }
 0x267   :  { %v374_v9 = vadd.f32 %v1515_v57, %v367_v11  ;;  %1089 = vmatpush.bf16.msrb.mxu1 %v1473_v47  ;;  %1127 = vmatpush.bf16.msrb.mxu3 %v1489_v58 }
 0x268   :  { %v373_v13 = vadd.f32 %v1515_v57, %v366_v12  ;;  %v1481_v57 = vld [vmem:[#allocation11 + $0x80] sm:$0xff] }
 0x26a   :  { %v376_v14 = vpack.c.bf16 %v374_v9, %v373_v13  ;;  %1102 = vmatpush.bf16.msrb.mxu2 %v1487_v26  ;;  %1066 = vmatpush.bf16.msrb.mxu0 %v1469_v28 }
 0x26e   :  { %1103 = vmatpush.bf16.msrb.mxu2 %v1486_v30  ;;  %1067 = vmatpush.bf16.msrb.mxu0 %v1468_v32 }
 0x272   :  { %1104 = vmatpush.bf16.msrb.mxu2 %v1485_v33  ;;  %1068 = vmatpush.bf16.msrb.mxu0 %v1467_v35 }
 0x274   :  { %592 = vmatmul.bf16.gmra.mxu0 %v376_v14  ;;  %611 = vmatmul.bf16.gmra.mxu1 %v376_v14 }
 0x275   :  { %630 = vmatmul.bf16.gmra.mxu2 %v376_v14  ;;  %649 = vmatmul.bf16.gmra.mxu3 %v376_v14 }
 0x276   :  { %1105 = vmatpush.bf16.msrb.mxu2 %v1484_v38  ;;  %1069 = vmatpush.bf16.msrb.mxu0 %v1466_v40 }
 0x27a   :  { %1106 = vmatpush.bf16.msrb.mxu2 %v1483_v43  ;;  %1070 = vmatpush.bf16.msrb.mxu0 %v1465_v49 }
 0x27e   :  { %1107 = vmatpush.bf16.msrb.mxu2 %v1482_v48 }
 0x282   :  { %1108 = vmatpush.bf16.msrb.mxu2 %v1481_v57 }
 0x2e1   :  { %v588_v45 = vpop.f32.mrf.mxu0  ;;  %v607_v46 = vpop.f32.mrf.mxu1 }
 0x2e2   :  { %v589_v50 = vadd.f32 %v588_v45, %v1968_v42  ;;  %v1974_v23 = vadd.f32 %v607_v46, %v1970_v16 }
 0x2e4   :  { %v671_v52 = vmul.f32 %v589_v50, %v589_v50  ;;  %v672_v24 = vmul.f32 %v1974_v23, %v1974_v23  ;;  %v655_v31 = vmul.f32 0.5, %v589_v50 }
 0x2e6   :  { %v687_v55 = vmul.f32 %v671_v52, %v589_v50  ;;  %v688_v56 = vmul.f32 %v672_v24, %v1974_v23 }
 0x2e8   :  { %v703_v59 = vmul.f32 0.044715, %v687_v55  ;;  %v704_v60 = vmul.f32 0.044715, %v688_v56  ;;  %v626_v5 = vpop.f32.mrf.mxu2  ;;  %v645_v0 = vpop.f32.mrf.mxu3  ;;  %v656_v55 = vmul.f32 0.5, %v1974_v23 }
 0x2e9   :  { %v627_v15 = vadd.f32 %v626_v5, %v1978_v53  ;;  %v646_v6 = vadd.f32 %v645_v0, %v1980_v54  ;;  %v590_v3 = vpop.f32.mrf.mxu0  ;;  %v609_v7 = vpop.f32.mrf.mxu1 }
 0x2ea   :  { %v719_v1 = vadd.f32 %v703_v59, %v589_v50  ;;  %v720_v2 = vadd.f32 %v704_v60, %v1974_v23  ;;  %v591_v11 = vadd.f32 %v590_v3, %v1968_v42  ;;  %v1988_v12 = vadd.f32 %v609_v7, %v1970_v16 }
 0x2eb   :  { %v673_v9 = vmul.f32 %v627_v15, %v627_v15  ;;  %v674_v13 = vmul.f32 %v646_v6, %v646_v6  ;;  %v2017_v57 = vmul.f32 0.5, %v627_v15  ;;  %v2019_v58 = vmul.f32 0.5, %v646_v6 }
 0x2ec   :  { %v735_v14 = vmul.f32 0.7978846, %v719_v1  ;;  %v736_v17 = vmul.f32 0.7978846, %v720_v2  ;;  %v675_v19 = vmul.f32 %v591_v11, %v591_v11  ;;  %v676_v20 = vmul.f32 %v1988_v12, %v1988_v12 }
 0x2ed   :  { %v689_v21 = vmul.f32 %v673_v9, %v627_v15  ;;  %v690_v18 = vmul.f32 %v674_v13, %v646_v6  ;;  %v659_v5 = vmul.f32 0.5, %v591_v11 }
 0x2ee   :  { %1553 = vtanh.f32 %v735_v14  ;;  %v691_v22 = vmul.f32 %v675_v19, %v591_v11  ;;  %v692_v8 = vmul.f32 %v676_v20, %v1988_v12  ;;  %v660_v20 = vmul.f32 0.5, %v1988_v12 }
 0x2ef   :  { %1555 = vtanh.f32 %v736_v17  ;;  %v705_v25 = vmul.f32 0.044715, %v689_v21  ;;  %v706_v26 = vmul.f32 0.044715, %v690_v18 }
 0x2f0   :  { %v707_v27 = vmul.f32 0.044715, %v691_v22  ;;  %v708_v28 = vmul.f32 0.044715, %v692_v8  ;;  %v628_v29 = vpop.f32.mrf.mxu2  ;;  %v647_v30 = vpop.f32.mrf.mxu3 }
 0x2f1   :  { %v721_v32 = vadd.f32 %v705_v25, %v627_v15  ;;  %v722_v10 = vadd.f32 %v706_v26, %v646_v6  ;;  %v1994_v33 = vadd.f32 %v628_v29, %v1978_v53  ;;  %v1997_v34 = vadd.f32 %v647_v30, %v1980_v54  ;;  %v593_v35 = vpop.f32.mrf.mxu0  ;;  %v612_v36 = vpop.f32.mrf.mxu1 }
 0x2f2   :  { %v723_v37 = vadd.f32 %v707_v27, %v591_v11  ;;  %v724_v38 = vadd.f32 %v708_v28, %v1988_v12  ;;  %v2001_v39 = vadd.f32 %v593_v35, %v1968_v42  ;;  %v2004_v40 = vadd.f32 %v612_v36, %v1970_v16 }
 0x2f3   :  { %v737_v41 = vmul.f32 0.7978846, %v721_v32  ;;  %v738_v43 = vmul.f32 0.7978846, %v722_v10  ;;  %v677_v44 = vmul.f32 %v1994_v33, %v1994_v33  ;;  %v678_v45 = vmul.f32 %v1997_v34, %v1997_v34 }
 0x2f4   :  { %v1554_v46 = vpop.eup %1553  ;;  %v739_v49 = vmul.f32 0.7978846, %v723_v37  ;;  %v740_v47 = vmul.f32 0.7978846, %v724_v38  ;;  %v679_v50 = vmul.f32 %v2001_v39, %v2001_v39  ;;  %v680_v48 = vmul.f32 %v2004_v40, %v2004_v40 }
 0x2f5   :  { %v1556_v51 = vpop.eup %1555  ;;  %1557 = vtanh.f32 %v737_v41  ;;  %v693_v52 = vmul.f32 %v677_v44, %v1994_v33  ;;  %v694_v24 = vmul.f32 %v678_v45, %v1997_v34  ;;  %v767_v56 = vadd.f32 1.0, %v1554_v46 }
 0x2f6   :  { %1559 = vtanh.f32 %v738_v43  ;;  %v695_v0 = vmul.f32 %v679_v50, %v2001_v39  ;;  %v696_v3 = vmul.f32 %v680_v48, %v2004_v40  ;;  %v768_v2 = vadd.f32 1.0, %v1556_v51 }
 0x2f7   :  { %1561 = vtanh.f32 %v739_v49  ;;  %v709_v59 = vmul.f32 0.044715, %v693_v52  ;;  %v710_v60 = vmul.f32 0.044715, %v694_v24  ;;  %v783_v19 = vmul.f32 %v767_v56, %v655_v31 }
 0x2f8   :  { %1563 = vtanh.f32 %v740_v47  ;;  %v631_v7 = vpop.f32.mrf.mxu2  ;;  %v650_v1 = vpop.f32.mrf.mxu3  ;;  %v711_v27 = vmul.f32 0.044715, %v695_v0  ;;  %v712_v28 = vmul.f32 0.044715, %v696_v3  ;;  %v784_v31 = vmul.f32 %v768_v2, %v656_v55 }
 0x2f9   :  { %v725_v23 = vadd.f32 %v709_v59, %v1994_v33  ;;  %v726_v9 = vadd.f32 %v710_v60, %v1997_v34  ;;  %v2026_v15 = vadd.f32 %v631_v7, %v1978_v53  ;;  %v2029_v6 = vadd.f32 %v650_v1, %v1980_v54  ;;  %v595_v13 = vpop.f32.mrf.mxu0  ;;  %v614_v11 = vpop.f32.mrf.mxu1 }
 0x2fa   :  { %v2032_v14 = vadd.f32 %v595_v13, %v1968_v42  ;;  %v2035_v17 = vadd.f32 %v614_v11, %v1970_v16  ;;  %v661_v38 = vmul.f32 0.5, %v1994_v33  ;;  %v662_v43 = vmul.f32 0.5, %v1997_v34 }
 0x2fb   :  { %v1558_v21 = vpop.eup %1557  ;;  %v741_v18 = vmul.f32 0.7978846, %v725_v23  ;;  %v742_v22 = vmul.f32 0.7978846, %v726_v9  ;;  %v681_v8 = vmul.f32 %v2026_v15, %v2026_v15  ;;  %v682_v25 = vmul.f32 %v2029_v6, %v2029_v6 }
 0x2fc   :  { %v1560_v26 = vpop.eup %1559  ;;  %v683_v42 = vmul.f32 %v2032_v14, %v2032_v14  ;;  %v684_v16 = vmul.f32 %v2035_v17, %v2035_v17  ;;  %v769_v41 = vadd.f32 1.0, %v1558_v21  ;;  %v727_v33 = vadd.f32 %v711_v27, %v2001_v39 }
 0x2fd   :  { %v1562_v29 = vpop.eup %1561  ;;  %1565 = vtanh.f32 %v741_v18  ;;  %v697_v12 = vmul.f32 %v681_v8, %v2026_v15  ;;  %v698_v30 = vmul.f32 %v682_v25, %v2029_v6  ;;  %v770_v50 = vadd.f32 1.0, %v1560_v26 }
 0x2fe   :  { %v1564_v32 = vpop.eup %1563  ;;  %1567 = vtanh.f32 %v742_v22  ;;  %v699_v10 = vmul.f32 %v683_v42, %v2032_v14  ;;  %v700_v35 = vmul.f32 %v684_v16, %v2035_v17  ;;  %v771_v36 = vadd.f32 1.0, %v1562_v29 }
 0x2ff   :  { %v772_v37 = vadd.f32 1.0, %v1564_v32  ;;  %v713_v44 = vmul.f32 0.044715, %v697_v12  ;;  %v714_v55 = vmul.f32 0.044715, %v698_v30  ;;  %v728_v2 = vadd.f32 %v712_v28, %v2004_v40 }
 0x300   :  { %v715_v45 = vmul.f32 0.044715, %v699_v10  ;;  %v633_v46 = vpop.f32.mrf.mxu2  ;;  %v652_v49 = vpop.f32.mrf.mxu3  ;;  %v787_v47 = vmul.f32 %v771_v36, %v659_v5  ;;  %v716_v48 = vmul.f32 0.044715, %v700_v35  ;;  %v743_v7 = vmul.f32 0.7978846, %v727_v33 }
 0x301   :  { %v2053_v51 = vadd.f32 %v633_v46, %v1978_v53  ;;  %v2056_v52 = vadd.f32 %v652_v49, %v1980_v54  ;;  %v788_v24 = vmul.f32 %v772_v37, %v660_v20  ;;  %v785_v53 = vmul.f32 %v769_v41, %v2017_v57 }
 0x302   :  { %v799_v56 = vpack.c.bf16 %v787_v47, %v783_v19  ;;  %v731_v34 = vadd.f32 %v715_v45, %v2032_v14  ;;  %v732_v11 = vadd.f32 %v716_v48, %v2035_v17  ;;  %v786_v20 = vmul.f32 %v770_v50, %v2019_v58 }
 0x303   :  { %v1566_v59 = vpop.eup %1565  ;;  %v685_v60 = vmul.f32 %v2053_v51, %v2053_v51  ;;  %v686_v5 = vmul.f32 %v2056_v52, %v2056_v52  ;;  %v800_v0 = vpack.c.bf16 %v788_v24, %v784_v31  ;;  %1569 = vtanh.f32 %v743_v7 }
 0x304   :  { %v1568_v3 = vpop.eup %1567  ;;  %1071 = vmatmul.bf16.vlgmr.msrb.gmra.mxu0 %v799_v56  ;;  %v773_v54 = vadd.f32 1.0, %v1566_v59  ;;  %v747_v1 = vmul.f32 0.7978846, %v731_v34  ;;  %v744_v57 = vmul.f32 0.7978846, %v728_v2  ;;  %v729_v27 = vadd.f32 %v713_v44, %v2026_v15 }
 0x305   :  { %v701_v23 = vmul.f32 %v685_v60, %v2053_v51  ;;  %v702_v9 = vmul.f32 %v686_v5, %v2056_v52  ;;  %1090 = vmatmul.bf16.vlgmr.msrb.gmra.mxu1 %v800_v0  ;;  %v774_v13 = vadd.f32 1.0, %v1568_v3  ;;  %v748_v25 = vmul.f32 0.7978846, %v732_v11 }
 0x306   :  { %v789_v19 = vmul.f32 %v773_v54, %v661_v38  ;;  %1571 = vtanh.f32 %v747_v1  ;;  %v730_v42 = vadd.f32 %v714_v55, %v2029_v6  ;;  %v745_v16 = vmul.f32 0.7978846, %v729_v27 }
 0x307   :  { %v717_v21 = vmul.f32 0.044715, %v701_v23  ;;  %v718_v18 = vmul.f32 0.044715, %v702_v9  ;;  %v790_v22 = vmul.f32 %v774_v13, %v662_v43  ;;  %1573 = vtanh.f32 %v744_v57 }
 0x308   :  { %v801_v8 = vpack.c.bf16 %v789_v19, %v785_v53  ;;  %1575 = vtanh.f32 %v748_v25  ;;  %v746_v30 = vmul.f32 0.7978846, %v730_v42  ;;  %v663_v36 = vmul.f32 0.5, %v2001_v39 }
 0x309   :  { %v802_v26 = vpack.c.bf16 %v790_v22, %v786_v20  ;;  %v733_v28 = vadd.f32 %v717_v21, %v2053_v51  ;;  %v734_v58 = vadd.f32 %v718_v18, %v2056_v52  ;;  %v1570_v12 = vpop.eup %1569  ;;  %1577 = vtanh.f32 %v745_v16 }
 0x30a   :  { %1109 = vmatmul.bf16.vlgmr.msrb.gmra.mxu2 %v801_v8  ;;  %v775_v10 = vadd.f32 1.0, %v1570_v12  ;;  %v667_v37 = vmul.f32 0.5, %v2032_v14  ;;  %v664_v46 = vmul.f32 0.5, %v2004_v40  ;;  %v668_v49 = vmul.f32 0.5, %v2035_v17 }
 0x30b   :  { %1128 = vmatmul.bf16.vlgmr.msrb.gmra.mxu3 %v802_v26  ;;  %v749_v29 = vmul.f32 0.7978846, %v733_v28  ;;  %v750_v31 = vmul.f32 0.7978846, %v734_v58  ;;  %v665_v34 = vmul.f32 0.5, %v2026_v15  ;;  %v669_v59 = vmul.f32 0.5, %v2053_v51 }
 0x30c   :  { %v1572_v32 = vpop.eup %1571  ;;  %v791_v44 = vmul.f32 %v775_v10, %v663_v36  ;;  %v666_v40 = vmul.f32 0.5, %v2029_v6  ;;  %v670_v3 = vmul.f32 0.5, %v2056_v52  ;;  %v1516_v52 = vld [vmem:[%s2103_s8] ss:$0 sm:$0xff]  ;;  %s1777_s8 = smov [#allocation13]  }
 0x30d   :  { %v1574_v35 = vpop.eup %1573  ;;  %v779_v38 = vadd.f32 1.0, %v1572_v32  ;;  %1579 = vtanh.f32 %v749_v29  ;;  %s1159_s1 = sshll.u32 %s1777_s8, 4  ;;  %s1160_s1 = int_to_ptr.vmem [resolvable:$true] %s1159_s1 }
 0x30e   :  { %v776_v41 = vadd.f32 1.0, %v1574_v35  ;;  %1581 = vtanh.f32 %v746_v30  ;;  %v1576_v43 = vpop.eup %1575 }
 0x30f   :  { %v795_v45 = vmul.f32 %v779_v38, %v667_v37  ;;  %1583 = vtanh.f32 %v750_v31  ;;  %v780_v47 = vadd.f32 1.0, %v1576_v43  ;;  %v1578_v48 = vpop.eup %1577 }
 0x310   :  { %v792_v24 = vmul.f32 %v776_v41, %v664_v46  ;;  %v777_v14 = vadd.f32 1.0, %v1578_v48 }
 0x311   :  { %v803_v50 = vpack.c.bf16 %v795_v45, %v791_v44  ;;  %v796_v55 = vmul.f32 %v780_v47, %v668_v49 }
 0x312   :  { %v793_v17 = vmul.f32 %v777_v14, %v665_v34 }
 0x313   :  { %v1580_v39 = vpop.eup %1579  ;;  %v804_v33 = vpack.c.bf16 %v796_v55, %v792_v24 }
 0x314   :  { %1076 = vmatmul.bf16.gmra.mxu0 %v803_v50  ;;  %v1582_v56 = vpop.eup %1581  ;;  %v781_v60 = vadd.f32 1.0, %v1580_v39 }
 0x315   :  { %v1584_v5 = vpop.eup %1583  ;;  %v778_v0 = vadd.f32 1.0, %v1582_v56  ;;  %1095 = vmatmul.bf16.gmra.mxu1 %v804_v33 }
 0x316   :  { %v797_v53 = vmul.f32 %v781_v60, %v669_v59  ;;  %v782_v54 = vadd.f32 1.0, %v1584_v5 }
 0x317   :  { %v794_v1 = vmul.f32 %v778_v0, %v666_v40 }
 0x318   :  { %v805_v7 = vpack.c.bf16 %v797_v53, %v793_v17  ;;  %v798_v2 = vmul.f32 %v782_v54, %v670_v3 }
 0x31a   :  { %1114 = vmatmul.bf16.gmra.mxu2 %v805_v7  ;;  %v806_v23 = vpack.c.bf16 %v798_v2, %v794_v1 }
 0x31c   :  { %1133 = vmatmul.bf16.gmra.mxu3 %v806_v23 }
 0x381   :  { %v1072_v15 = vpop.f32.mrf.mxu0 }
 0x382   :  { %v1091_v9 = vpop.f32.mrf.mxu1 }
 0x383   :  { %v1092_v51 = vadd.f32 %v1091_v9, %v1072_v15 }
 0x389   :  { %v1074_v13 = vpop.f32.mrf.mxu0 }
 0x38a   :  { %v1093_v19 = vpop.f32.mrf.mxu1 }
 0x38b   :  { %v1094_v18 = vadd.f32 %v1093_v19, %v1074_v13 }
 0x38d   :  { %v1110_v11 = vpop.f32.mrf.mxu2 }
 0x38e   :  { %v1111_v6 = vadd.f32 %v1110_v11, %v1092_v51  ;;  %v1129_v20 = vpop.f32.mrf.mxu3 }
 0x390   :  { %v1130_v57 = vadd.f32 %v1129_v20, %v1111_v6 }
 0x391   :  { %v1077_v27 = vpop.f32.mrf.mxu0 }
 0x392   :  { %v1139_v21 = vadd.f32 %v1130_v57, %v1901_v63  ;;  %v1096_v28 = vpop.f32.mrf.mxu1 }
 0x393   :  { %v1097_v29 = vadd.f32 %v1096_v28, %v1077_v27 }
 0x394   :  { %v1147_v22 = vadd.f32 %v1516_v52, %v1139_v21 }
 0x395   :  { %v1112_v8 = vpop.f32.mrf.mxu2 }
 0x396   :  { %1151 = vst [vmem:[#allocation13] sm:$0xff] %v1147_v22  ;;  %v1113_v25 = vadd.f32 %v1112_v8, %v1094_v18  ;;  %v1131_v26 = vpop.f32.mrf.mxu3 }
 0x398   :  { %v1132_v42 = vadd.f32 %v1131_v26, %v1113_v25 }
 0x399   :  { %v1079_v10 = vpop.f32.mrf.mxu0 }
 0x39a   :  { %v1140_v58 = vadd.f32 %v1132_v42, %v1898_v62  ;;  %v1098_v63 = vpop.f32.mrf.mxu1 }
 0x39b   :  { %v1099_v36 = vadd.f32 %v1098_v63, %v1079_v10 }
 0x39c   :  { %v1148_v16 = vadd.f32 %v1516_v52, %v1140_v58 }
 0x39d   :  { %v1115_v12 = vpop.f32.mrf.mxu2 }
 0x39e   :  { %1152 = vst [vmem:[#allocation13 + $0x8] sm:$0xff] %v1148_v16  ;;  %v1116_v30 = vadd.f32 %v1115_v12, %v1097_v29 }
 0x39f   :  { %v1134_v31 = vpop.f32.mrf.mxu3 }
 0x3a0   :  { %v1135_v32 = vadd.f32 %v1134_v31, %v1116_v30 }
 0x3a2   :  { %v1141_v35 = vadd.f32 %v1135_v32, %v1895_v61 }
 0x3a4   :  { %v1149_v37 = vadd.f32 %v1516_v52, %v1141_v35 }
 0x3a5   :  { %v1117_v38 = vpop.f32.mrf.mxu2 }
 0x3a6   :  { %1153 = vst [vmem:[#allocation13 + $0x10] sm:$0xff] %v1149_v37  ;;  %v1118_v41 = vadd.f32 %v1117_v38, %v1099_v36 }
 0x3a7   :  { %v1136_v43 = vpop.f32.mrf.mxu3 }
 0x3a8   :  { %v1137_v44 = vadd.f32 %v1136_v43, %v1118_v41 }
 0x3aa   :  { %v1142_v62 = vadd.f32 %v1137_v44, %v1907_v4 }
 0x3ac   :  { %v1150_v45 = vadd.f32 %v1516_v52, %v1142_v62 }
 0x3ae   :  { %1154 = vst [vmem:[#allocation13 + $0x18] sm:$0xff] %v1150_v45 }
 0x3af   :  { %1167 = dma.vmem_to_hbm [thread:$0]  %s1160_s1, 512, %s1162_s24, [#allocation4], %s1766_s26, %s1766_s26, %s1767_s4  }
 0x3b0   :  { %1761 = dma.done.wait [#allocation4], 512  }
 0x3b1   :  { %1762 = vsyncadd [#allocation4], 4294966784 }
 0x3b2   :  { %1172 = vsyncpa [#allocation3], 1 }
 0x3b3   :  { %1173 = vsyncpa [#allocation6], 1 }
 0x3b4   :  { %1174 = vsyncpa [#allocation9], 1 }
 0x3b5   :  { %1175 = vsyncpa [#allocation12], 1 }
 0x3b6   :  { %1176 = vsyncpa [#allocation4], 1 }

</bundles_post_ra>
